<compile_context>
chip_gen: v6e
topology: v6e:2x2x1
jax: 0.10.0
libtpu: 0.0.40
codegen_flags: <defaults>
</compile_context>

<pallas_src>
import jax
import jax.numpy as jnp
from jax import lax
from jax.experimental import pallas as pl
from jax.experimental.pallas import tpu as pltpu

HP = 128            # per-gate lane-padded width (one full vreg lane dimension)
G4 = 4 * HP         # fused gate width: i|f|g|o blocks at lane offsets 0/128/256/384


def lstm_kernel(x_ref, wih_ref, whh_ref, b_ref, wout_ref, bout_ref, out_ref):
    # x_ref:    (T, 1)      input for the single batch row the output consumes
    # wih_ref:  (1, 512)    fused, gate-padded input->gate weights (g-gate pre-scaled x2)
    # whh_ref:  (128, 512)  fused, gate-padded hidden->gate weights (rows 20..127 zero)
    # b_ref:    (1, 512)    fused bias b_ih + b_hh, gate-padded, g entries pre-scaled x2
    # wout_ref: (1, 128)    output projection row (entries 20..127 zero)
    # bout_ref: (1, 1)      output projection bias
    # out_ref:  (T, 1)
    T = x_ref.shape[0]

    # Recurrent weights into vregs once for the whole recurrence.
    whh = whh_ref[...]                                      # (128, 512)

    # Input projection + bias hoisted out of the serial loop (input_size == 1):
    # one VPU broadcast multiply-add over all T steps.
    xb = x_ref[...] * wih_ref[...] + b_ref[...]             # (T, 512)

    h = jnp.zeros((1, HP), jnp.float32)
    c = jnp.zeros((1, HP), jnp.float32)
    hs = []
    for t in range(T):                                      # fully unrolled (T static)
        # Single fused gate matmul per step (PyTorch gate order i, f, g, o).
        z = jnp.dot(h, whh, preferred_element_type=jnp.float32) + xb[t:t + 1, :]
        sig = jax.nn.sigmoid(z)                             # ONE EUP pass on (1, 512)
        i_g = sig[:, 0 * HP:1 * HP]                         # whole-vreg, lane-aligned slices
        f_g = sig[:, 1 * HP:2 * HP]
        g_g = 2.0 * sig[:, 2 * HP:3 * HP] - 1.0             # tanh via pre-scaled g-gate
        o_g = sig[:, 3 * HP:4 * HP]
        c = f_g * c + i_g * g_g
        h = o_g * jnp.tanh(c)                               # only remaining per-step EUP op
        hs.append(h)

    # Hidden-state history stays in registers: (8, 128) f32 = one vreg.
    hs_all = jnp.concatenate(hs, axis=0)                    # (T, 128)
    # Linear(20 -> 1) as broadcast-mul + lane reduce: no epilogue MXU fill.
    out_ref[...] = (jnp.sum(hs_all * wout_ref[...], axis=-1, keepdims=True)
                    + bout_ref[...])


def pack_lstm_params(w_ih, w_hh, b_ih, b_hh, w_out, b_out):
    """One-time repack of PyTorch-layout params into the fused, gate-padded,
    pre-scaled kernel layout.  Call once; pass the results to lstm_forward."""
    H = w_hh.shape[1]
    # tanh(x) = 2*sigmoid(2x) - 1  ->  pre-scale the g-gate pre-activation by 2.
    scale = jnp.concatenate([jnp.ones((H,)), jnp.ones((H,)),
                             2.0 * jnp.ones((H,)), jnp.ones((H,))]).astype(jnp.float32)

    def pad_gates(m):                                       # (rows, 4H) -> (rows, 4*HP)
        rows = m.shape[0]
        out = jnp.zeros((rows, G4), jnp.float32)
        for k in range(4):
            out = out.at[:, k * HP:k * HP + H].set(m[:, k * H:(k + 1) * H])
        return out

    wih_k = pad_gates((w_ih.reshape(1, 4 * H) * scale).astype(jnp.float32))      # (1, 512)
    whh_k = jnp.zeros((HP, G4), jnp.float32).at[:H, :].set(
        pad_gates((w_hh.T * scale).astype(jnp.float32)))                         # (128, 512)
    b_k = pad_gates(((b_ih + b_hh) * scale).reshape(1, 4 * H).astype(jnp.float32))  # (1, 512)
    wout_k = jnp.zeros((1, HP), jnp.float32).at[:, :H].set(
        w_out.reshape(1, H).astype(jnp.float32))                                 # (1, 128)
    bout_k = b_out.reshape(1, 1).astype(jnp.float32)                             # (1, 1)
    return wih_k, whh_k, b_k, wout_k, bout_k


@jax.jit
def lstm_forward(x, wih_k, whh_k, b_k, wout_k, bout_k):
    """x: (T, B, 1) float32 (time-major).  Packed params from pack_lstm_params.
    Returns (T, 1) float32, identical to Linear(LSTM(x)[0][:, -1, :])."""
    T, B, _ = x.shape
    # r_out[:, -1, :] only consumes batch row B-1; batch rows are independent in
    # the recurrence, so feed only that row to the kernel (exact same result).
    x_last = x[:, B - 1, :].astype(jnp.float32)             # (T, 1)

    vmem = pl.BlockSpec(memory_space=pltpu.MemorySpace.VMEM)
    return pl.pallas_call(
        lstm_kernel,
        out_shape=jax.ShapeDtypeStruct((T, 1), jnp.float32),
        in_specs=[vmem] * 6,
        out_specs=vmem,
    )(x_last, wih_k, whh_k, b_k, wout_k, bout_k)


def _reference(x, w_ih, w_hh, b_ih, b_hh, w_out, b_out):
    """Pure-JAX full-batch reference of torch.nn.LSTM + the forward's indexing."""
    T, B, _ = x.shape
    H = w_hh.shape[1]
    h = jnp.zeros((B, H), jnp.float32)
    c = jnp.zeros((B, H), jnp.float32)

    def step(carry, x_t):
        h, c = carry
        gates = x_t @ w_ih.T + b_ih + h @ w_hh.T + b_hh      # (B, 4H)
        i, f, g, o = jnp.split(gates, 4, axis=-1)
        i, f, o = jax.nn.sigmoid(i), jax.nn.sigmoid(f), jax.nn.sigmoid(o)
        g = jnp.tanh(g)
        c = f * c + i * g
        h = o * jnp.tanh(c)
        return (h, c), h

    _, r_out = lax.scan(step, (h, c), x)                      # (T, B, H)
    return r_out[:, -1, :] @ w_out.T + b_out                  # (T, 1)


if __name__ == "__main__":
    T, B, H = 8, 2, 20
    key = jax.random.PRNGKey(0)
    k = jax.random.split(key, 8)
    bound = 1.0 / jnp.sqrt(H)

    x = jax.random.normal(k[0], (T, B, 1), dtype=jnp.float32)
    w_ih = jax.random.uniform(k[1], (4 * H, 1), jnp.float32, -bound, bound)
    w_hh = jax.random.uniform(k[2], (4 * H, H), jnp.float32, -bound, bound)
    b_ih = jax.random.uniform(k[3], (4 * H,), jnp.float32, -bound, bound)
    b_hh = jax.random.uniform(k[4], (4 * H,), jnp.float32, -bound, bound)
    w_out = jax.random.uniform(k[5], (1, H), jnp.float32, -bound, bound)
    b_out = jax.random.uniform(k[6], (1,), jnp.float32, -bound, bound)

    # Params packed ONCE, outside the per-call jit path.
    packed = pack_lstm_params(w_ih, w_hh, b_ih, b_hh, w_out, b_out)
    packed = jax.block_until_ready(packed)

    out = lstm_forward(x, *packed)
    out = jax.block_until_ready(out)

    ref = _reference(x, w_ih, w_hh, b_ih, b_hh, w_out, b_out)
    assert out.shape == (T, 1), out.shape
    assert jnp.allclose(out, ref, atol=1e-5, rtol=1e-5), (out, ref)
    print("KERNEL_OK")
</pallas_src>

<mosaic_0001>
module attributes {stable_mosaic.version = 11 : i64} {
  func.func @lstm_kernel(%arg0: memref<8x1xf32, #tpu.memory_space<vmem>>, %arg1: memref<1x512xf32, #tpu.memory_space<vmem>>, %arg2: memref<128x512xf32, #tpu.memory_space<vmem>>, %arg3: memref<1x512xf32, #tpu.memory_space<vmem>>, %arg4: memref<1x128xf32, #tpu.memory_space<vmem>>, %arg5: memref<1x1xf32, #tpu.memory_space<vmem>>, %arg6: memref<8x1xf32, #tpu.memory_space<vmem>>) attributes {dimension_semantics = [], scalar_prefetch = 0 : i64, scratch_operands = 0 : i64, tpu.core_type = #tpu.core_type<tc>} {
    %c0 = arith.constant 0 : index
    %c0_0 = arith.constant 0 : index
    %0 = vector.load %arg2[%c0, %c0_0] : memref<128x512xf32, #tpu.memory_space<vmem>>, vector<128x512xf32>
    %c0_1 = arith.constant 0 : index
    %c0_2 = arith.constant 0 : index
    %1 = vector.load %arg0[%c0_1, %c0_2] : memref<8x1xf32, #tpu.memory_space<vmem>>, vector<8x1xf32>
    %c0_3 = arith.constant 0 : index
    %c0_4 = arith.constant 0 : index
    %2 = vector.load %arg1[%c0_3, %c0_4] : memref<1x512xf32, #tpu.memory_space<vmem>>, vector<1x512xf32>
    %3 = vector.broadcast %1 : vector<8x1xf32> to vector<8x512xf32>
    %4 = vector.broadcast %2 : vector<1x512xf32> to vector<8x512xf32>
    %5 = arith.mulf %3, %4 : vector<8x512xf32>
    %c0_5 = arith.constant 0 : index
    %c0_6 = arith.constant 0 : index
    %6 = vector.load %arg3[%c0_5, %c0_6] : memref<1x512xf32, #tpu.memory_space<vmem>>, vector<1x512xf32>
    %7 = vector.broadcast %6 : vector<1x512xf32> to vector<8x512xf32>
    %8 = arith.addf %5, %7 : vector<8x512xf32>
    %cst = arith.constant 0.000000e+00 : f32
    %9 = vector.broadcast %cst : f32 to vector<1x128xf32>
    %cst_7 = arith.constant 0.000000e+00 : f32
    %10 = vector.broadcast %cst_7 : f32 to vector<1x128xf32>
    %cst_8 = arith.constant dense<0.000000e+00> : vector<1x512xf32>
    %11 = tpu.matmul %9, %0, %cst_8 {dimension_numbers = #tpu.dot_dimension_numbers<[1], [0], [0], [1], [0, 0, 1, 1], [], []>} : vector<1x128xf32>, vector<128x512xf32>, vector<1x512xf32> -> vector<1x512xf32>
    %12 = vector.extract_strided_slice %8 {offsets = [0, 0], sizes = [1, 512], strides = [1, 1]} : vector<8x512xf32> to vector<1x512xf32>
    %13 = arith.addf %11, %12 : vector<1x512xf32>
    %14 = arith.negf %13 : vector<1x512xf32>
    %15 = math.exp %14 : vector<1x512xf32>
    %cst_9 = arith.constant 1.000000e+00 : f32
    %16 = vector.broadcast %cst_9 : f32 to vector<1x512xf32>
    %17 = arith.addf %16, %15 : vector<1x512xf32>
    %18 = arith.divf %16, %17 : vector<1x512xf32>
    %19 = vector.extract_strided_slice %18 {offsets = [0, 0], sizes = [1, 128], strides = [1, 1]} : vector<1x512xf32> to vector<1x128xf32>
    %20 = vector.extract_strided_slice %18 {offsets = [0, 128], sizes = [1, 128], strides = [1, 1]} : vector<1x512xf32> to vector<1x128xf32>
    %21 = vector.extract_strided_slice %18 {offsets = [0, 256], sizes = [1, 128], strides = [1, 1]} : vector<1x512xf32> to vector<1x128xf32>
    %cst_10 = arith.constant 2.000000e+00 : f32
    %22 = vector.broadcast %cst_10 : f32 to vector<1x128xf32>
    %23 = arith.mulf %22, %21 : vector<1x128xf32>
    %cst_11 = arith.constant 1.000000e+00 : f32
    %24 = vector.broadcast %cst_11 : f32 to vector<1x128xf32>
    %25 = arith.subf %23, %24 : vector<1x128xf32>
    %26 = vector.extract_strided_slice %18 {offsets = [0, 384], sizes = [1, 128], strides = [1, 1]} : vector<1x512xf32> to vector<1x128xf32>
    %27 = arith.mulf %20, %10 : vector<1x128xf32>
    %28 = arith.mulf %19, %25 : vector<1x128xf32>
    %29 = arith.addf %27, %28 : vector<1x128xf32>
    %30 = math.tanh %29 : vector<1x128xf32>
    %31 = arith.mulf %26, %30 : vector<1x128xf32>
    %cst_12 = arith.constant dense<0.000000e+00> : vector<1x512xf32>
    %32 = tpu.matmul %31, %0, %cst_12 {dimension_numbers = #tpu.dot_dimension_numbers<[1], [0], [0], [1], [0, 0, 1, 1], [], []>} : vector<1x128xf32>, vector<128x512xf32>, vector<1x512xf32> -> vector<1x512xf32>
    %33 = vector.extract_strided_slice %8 {offsets = [1, 0], sizes = [1, 512], strides = [1, 1]} : vector<8x512xf32> to vector<1x512xf32>
    %34 = arith.addf %32, %33 : vector<1x512xf32>
    %35 = arith.negf %34 : vector<1x512xf32>
    %36 = math.exp %35 : vector<1x512xf32>
    %cst_13 = arith.constant 1.000000e+00 : f32
    %37 = vector.broadcast %cst_13 : f32 to vector<1x512xf32>
    %38 = arith.addf %37, %36 : vector<1x512xf32>
    %39 = arith.divf %37, %38 : vector<1x512xf32>
    %40 = vector.extract_strided_slice %39 {offsets = [0, 0], sizes = [1, 128], strides = [1, 1]} : vector<1x512xf32> to vector<1x128xf32>
    %41 = vector.extract_strided_slice %39 {offsets = [0, 128], sizes = [1, 128], strides = [1, 1]} : vector<1x512xf32> to vector<1x128xf32>
    %42 = vector.extract_strided_slice %39 {offsets = [0, 256], sizes = [1, 128], strides = [1, 1]} : vector<1x512xf32> to vector<1x128xf32>
    %cst_14 = arith.constant 2.000000e+00 : f32
    %43 = vector.broadcast %cst_14 : f32 to vector<1x128xf32>
    %44 = arith.mulf %43, %42 : vector<1x128xf32>
    %cst_15 = arith.constant 1.000000e+00 : f32
    %45 = vector.broadcast %cst_15 : f32 to vector<1x128xf32>
    %46 = arith.subf %44, %45 : vector<1x128xf32>
    %47 = vector.extract_strided_slice %39 {offsets = [0, 384], sizes = [1, 128], strides = [1, 1]} : vector<1x512xf32> to vector<1x128xf32>
    %48 = arith.mulf %41, %29 : vector<1x128xf32>
    %49 = arith.mulf %40, %46 : vector<1x128xf32>
    %50 = arith.addf %48, %49 : vector<1x128xf32>
    %51 = math.tanh %50 : vector<1x128xf32>
    %52 = arith.mulf %47, %51 : vector<1x128xf32>
    %cst_16 = arith.constant dense<0.000000e+00> : vector<1x512xf32>
    %53 = tpu.matmul %52, %0, %cst_16 {dimension_numbers = #tpu.dot_dimension_numbers<[1], [0], [0], [1], [0, 0, 1, 1], [], []>} : vector<1x128xf32>, vector<128x512xf32>, vector<1x512xf32> -> vector<1x512xf32>
    %54 = vector.extract_strided_slice %8 {offsets = [2, 0], sizes = [1, 512], strides = [1, 1]} : vector<8x512xf32> to vector<1x512xf32>
    %55 = arith.addf %53, %54 : vector<1x512xf32>
    %56 = arith.negf %55 : vector<1x512xf32>
    %57 = math.exp %56 : vector<1x512xf32>
    %cst_17 = arith.constant 1.000000e+00 : f32
    %58 = vector.broadcast %cst_17 : f32 to vector<1x512xf32>
    %59 = arith.addf %58, %57 : vector<1x512xf32>
    %60 = arith.divf %58, %59 : vector<1x512xf32>
    %61 = vector.extract_strided_slice %60 {offsets = [0, 0], sizes = [1, 128], strides = [1, 1]} : vector<1x512xf32> to vector<1x128xf32>
    %62 = vector.extract_strided_slice %60 {offsets = [0, 128], sizes = [1, 128], strides = [1, 1]} : vector<1x512xf32> to vector<1x128xf32>
    %63 = vector.extract_strided_slice %60 {offsets = [0, 256], sizes = [1, 128], strides = [1, 1]} : vector<1x512xf32> to vector<1x128xf32>
    %cst_18 = arith.constant 2.000000e+00 : f32
    %64 = vector.broadcast %cst_18 : f32 to vector<1x128xf32>
    %65 = arith.mulf %64, %63 : vector<1x128xf32>
    %cst_19 = arith.constant 1.000000e+00 : f32
    %66 = vector.broadcast %cst_19 : f32 to vector<1x128xf32>
    %67 = arith.subf %65, %66 : vector<1x128xf32>
    %68 = vector.extract_strided_slice %60 {offsets = [0, 384], sizes = [1, 128], strides = [1, 1]} : vector<1x512xf32> to vector<1x128xf32>
    %69 = arith.mulf %62, %50 : vector<1x128xf32>
    %70 = arith.mulf %61, %67 : vector<1x128xf32>
    %71 = arith.addf %69, %70 : vector<1x128xf32>
    %72 = math.tanh %71 : vector<1x128xf32>
    %73 = arith.mulf %68, %72 : vector<1x128xf32>
    %cst_20 = arith.constant dense<0.000000e+00> : vector<1x512xf32>
    %74 = tpu.matmul %73, %0, %cst_20 {dimension_numbers = #tpu.dot_dimension_numbers<[1], [0], [0], [1], [0, 0, 1, 1], [], []>} : vector<1x128xf32>, vector<128x512xf32>, vector<1x512xf32> -> vector<1x512xf32>
    %75 = vector.extract_strided_slice %8 {offsets = [3, 0], sizes = [1, 512], strides = [1, 1]} : vector<8x512xf32> to vector<1x512xf32>
    %76 = arith.addf %74, %75 : vector<1x512xf32>
    %77 = arith.negf %76 : vector<1x512xf32>
    %78 = math.exp %77 : vector<1x512xf32>
    %cst_21 = arith.constant 1.000000e+00 : f32
    %79 = vector.broadcast %cst_21 : f32 to vector<1x512xf32>
    %80 = arith.addf %79, %78 : vector<1x512xf32>
    %81 = arith.divf %79, %80 : vector<1x512xf32>
    %82 = vector.extract_strided_slice %81 {offsets = [0, 0], sizes = [1, 128], strides = [1, 1]} : vector<1x512xf32> to vector<1x128xf32>
    %83 = vector.extract_strided_slice %81 {offsets = [0, 128], sizes = [1, 128], strides = [1, 1]} : vector<1x512xf32> to vector<1x128xf32>
    %84 = vector.extract_strided_slice %81 {offsets = [0, 256], sizes = [1, 128], strides = [1, 1]} : vector<1x512xf32> to vector<1x128xf32>
    %cst_22 = arith.constant 2.000000e+00 : f32
    %85 = vector.broadcast %cst_22 : f32 to vector<1x128xf32>
    %86 = arith.mulf %85, %84 : vector<1x128xf32>
    %cst_23 = arith.constant 1.000000e+00 : f32
    %87 = vector.broadcast %cst_23 : f32 to vector<1x128xf32>
    %88 = arith.subf %86, %87 : vector<1x128xf32>
    %89 = vector.extract_strided_slice %81 {offsets = [0, 384], sizes = [1, 128], strides = [1, 1]} : vector<1x512xf32> to vector<1x128xf32>
    %90 = arith.mulf %83, %71 : vector<1x128xf32>
    %91 = arith.mulf %82, %88 : vector<1x128xf32>
    %92 = arith.addf %90, %91 : vector<1x128xf32>
    %93 = math.tanh %92 : vector<1x128xf32>
    %94 = arith.mulf %89, %93 : vector<1x128xf32>
    %cst_24 = arith.constant dense<0.000000e+00> : vector<1x512xf32>
    %95 = tpu.matmul %94, %0, %cst_24 {dimension_numbers = #tpu.dot_dimension_numbers<[1], [0], [0], [1], [0, 0, 1, 1], [], []>} : vector<1x128xf32>, vector<128x512xf32>, vector<1x512xf32> -> vector<1x512xf32>
    %96 = vector.extract_strided_slice %8 {offsets = [4, 0], sizes = [1, 512], strides = [1, 1]} : vector<8x512xf32> to vector<1x512xf32>
    %97 = arith.addf %95, %96 : vector<1x512xf32>
    %98 = arith.negf %97 : vector<1x512xf32>
    %99 = math.exp %98 : vector<1x512xf32>
    %cst_25 = arith.constant 1.000000e+00 : f32
    %100 = vector.broadcast %cst_25 : f32 to vector<1x512xf32>
    %101 = arith.addf %100, %99 : vector<1x512xf32>
    %102 = arith.divf %100, %101 : vector<1x512xf32>
    %103 = vector.extract_strided_slice %102 {offsets = [0, 0], sizes = [1, 128], strides = [1, 1]} : vector<1x512xf32> to vector<1x128xf32>
    %104 = vector.extract_strided_slice %102 {offsets = [0, 128], sizes = [1, 128], strides = [1, 1]} : vector<1x512xf32> to vector<1x128xf32>
    %105 = vector.extract_strided_slice %102 {offsets = [0, 256], sizes = [1, 128], strides = [1, 1]} : vector<1x512xf32> to vector<1x128xf32>
    %cst_26 = arith.constant 2.000000e+00 : f32
    %106 = vector.broadcast %cst_26 : f32 to vector<1x128xf32>
    %107 = arith.mulf %106, %105 : vector<1x128xf32>
    %cst_27 = arith.constant 1.000000e+00 : f32
    %108 = vector.broadcast %cst_27 : f32 to vector<1x128xf32>
    %109 = arith.subf %107, %108 : vector<1x128xf32>
    %110 = vector.extract_strided_slice %102 {offsets = [0, 384], sizes = [1, 128], strides = [1, 1]} : vector<1x512xf32> to vector<1x128xf32>
    %111 = arith.mulf %104, %92 : vector<1x128xf32>
    %112 = arith.mulf %103, %109 : vector<1x128xf32>
    %113 = arith.addf %111, %112 : vector<1x128xf32>
    %114 = math.tanh %113 : vector<1x128xf32>
    %115 = arith.mulf %110, %114 : vector<1x128xf32>
    %cst_28 = arith.constant dense<0.000000e+00> : vector<1x512xf32>
    %116 = tpu.matmul %115, %0, %cst_28 {dimension_numbers = #tpu.dot_dimension_numbers<[1], [0], [0], [1], [0, 0, 1, 1], [], []>} : vector<1x128xf32>, vector<128x512xf32>, vector<1x512xf32> -> vector<1x512xf32>
    %117 = vector.extract_strided_slice %8 {offsets = [5, 0], sizes = [1, 512], strides = [1, 1]} : vector<8x512xf32> to vector<1x512xf32>
    %118 = arith.addf %116, %117 : vector<1x512xf32>
    %119 = arith.negf %118 : vector<1x512xf32>
    %120 = math.exp %119 : vector<1x512xf32>
    %cst_29 = arith.constant 1.000000e+00 : f32
    %121 = vector.broadcast %cst_29 : f32 to vector<1x512xf32>
    %122 = arith.addf %121, %120 : vector<1x512xf32>
    %123 = arith.divf %121, %122 : vector<1x512xf32>
    %124 = vector.extract_strided_slice %123 {offsets = [0, 0], sizes = [1, 128], strides = [1, 1]} : vector<1x512xf32> to vector<1x128xf32>
    %125 = vector.extract_strided_slice %123 {offsets = [0, 128], sizes = [1, 128], strides = [1, 1]} : vector<1x512xf32> to vector<1x128xf32>
    %126 = vector.extract_strided_slice %123 {offsets = [0, 256], sizes = [1, 128], strides = [1, 1]} : vector<1x512xf32> to vector<1x128xf32>
    %cst_30 = arith.constant 2.000000e+00 : f32
    %127 = vector.broadcast %cst_30 : f32 to vector<1x128xf32>
    %128 = arith.mulf %127, %126 : vector<1x128xf32>
    %cst_31 = arith.constant 1.000000e+00 : f32
    %129 = vector.broadcast %cst_31 : f32 to vector<1x128xf32>
    %130 = arith.subf %128, %129 : vector<1x128xf32>
    %131 = vector.extract_strided_slice %123 {offsets = [0, 384], sizes = [1, 128], strides = [1, 1]} : vector<1x512xf32> to vector<1x128xf32>
    %132 = arith.mulf %125, %113 : vector<1x128xf32>
    %133 = arith.mulf %124, %130 : vector<1x128xf32>
    %134 = arith.addf %132, %133 : vector<1x128xf32>
    %135 = math.tanh %134 : vector<1x128xf32>
    %136 = arith.mulf %131, %135 : vector<1x128xf32>
    %cst_32 = arith.constant dense<0.000000e+00> : vector<1x512xf32>
    %137 = tpu.matmul %136, %0, %cst_32 {dimension_numbers = #tpu.dot_dimension_numbers<[1], [0], [0], [1], [0, 0, 1, 1], [], []>} : vector<1x128xf32>, vector<128x512xf32>, vector<1x512xf32> -> vector<1x512xf32>
    %138 = vector.extract_strided_slice %8 {offsets = [6, 0], sizes = [1, 512], strides = [1, 1]} : vector<8x512xf32> to vector<1x512xf32>
    %139 = arith.addf %137, %138 : vector<1x512xf32>
    %140 = arith.negf %139 : vector<1x512xf32>
    %141 = math.exp %140 : vector<1x512xf32>
    %cst_33 = arith.constant 1.000000e+00 : f32
    %142 = vector.broadcast %cst_33 : f32 to vector<1x512xf32>
    %143 = arith.addf %142, %141 : vector<1x512xf32>
    %144 = arith.divf %142, %143 : vector<1x512xf32>
    %145 = vector.extract_strided_slice %144 {offsets = [0, 0], sizes = [1, 128], strides = [1, 1]} : vector<1x512xf32> to vector<1x128xf32>
    %146 = vector.extract_strided_slice %144 {offsets = [0, 128], sizes = [1, 128], strides = [1, 1]} : vector<1x512xf32> to vector<1x128xf32>
    %147 = vector.extract_strided_slice %144 {offsets = [0, 256], sizes = [1, 128], strides = [1, 1]} : vector<1x512xf32> to vector<1x128xf32>
    %cst_34 = arith.constant 2.000000e+00 : f32
    %148 = vector.broadcast %cst_34 : f32 to vector<1x128xf32>
    %149 = arith.mulf %148, %147 : vector<1x128xf32>
    %cst_35 = arith.constant 1.000000e+00 : f32
    %150 = vector.broadcast %cst_35 : f32 to vector<1x128xf32>
    %151 = arith.subf %149, %150 : vector<1x128xf32>
    %152 = vector.extract_strided_slice %144 {offsets = [0, 384], sizes = [1, 128], strides = [1, 1]} : vector<1x512xf32> to vector<1x128xf32>
    %153 = arith.mulf %146, %134 : vector<1x128xf32>
    %154 = arith.mulf %145, %151 : vector<1x128xf32>
    %155 = arith.addf %153, %154 : vector<1x128xf32>
    %156 = math.tanh %155 : vector<1x128xf32>
    %157 = arith.mulf %152, %156 : vector<1x128xf32>
    %cst_36 = arith.constant dense<0.000000e+00> : vector<1x512xf32>
    %158 = tpu.matmul %157, %0, %cst_36 {dimension_numbers = #tpu.dot_dimension_numbers<[1], [0], [0], [1], [0, 0, 1, 1], [], []>} : vector<1x128xf32>, vector<128x512xf32>, vector<1x512xf32> -> vector<1x512xf32>
    %159 = vector.extract_strided_slice %8 {offsets = [7, 0], sizes = [1, 512], strides = [1, 1]} : vector<8x512xf32> to vector<1x512xf32>
    %160 = arith.addf %158, %159 : vector<1x512xf32>
    %161 = arith.negf %160 : vector<1x512xf32>
    %162 = math.exp %161 : vector<1x512xf32>
    %cst_37 = arith.constant 1.000000e+00 : f32
    %163 = vector.broadcast %cst_37 : f32 to vector<1x512xf32>
    %164 = arith.addf %163, %162 : vector<1x512xf32>
    %165 = arith.divf %163, %164 : vector<1x512xf32>
    %166 = vector.extract_strided_slice %165 {offsets = [0, 0], sizes = [1, 128], strides = [1, 1]} : vector<1x512xf32> to vector<1x128xf32>
    %167 = vector.extract_strided_slice %165 {offsets = [0, 128], sizes = [1, 128], strides = [1, 1]} : vector<1x512xf32> to vector<1x128xf32>
    %168 = vector.extract_strided_slice %165 {offsets = [0, 256], sizes = [1, 128], strides = [1, 1]} : vector<1x512xf32> to vector<1x128xf32>
    %cst_38 = arith.constant 2.000000e+00 : f32
    %169 = vector.broadcast %cst_38 : f32 to vector<1x128xf32>
    %170 = arith.mulf %169, %168 : vector<1x128xf32>
    %cst_39 = arith.constant 1.000000e+00 : f32
    %171 = vector.broadcast %cst_39 : f32 to vector<1x128xf32>
    %172 = arith.subf %170, %171 : vector<1x128xf32>
    %173 = vector.extract_strided_slice %165 {offsets = [0, 384], sizes = [1, 128], strides = [1, 1]} : vector<1x512xf32> to vector<1x128xf32>
    %174 = arith.mulf %167, %155 : vector<1x128xf32>
    %175 = arith.mulf %166, %172 : vector<1x128xf32>
    %176 = arith.addf %174, %175 : vector<1x128xf32>
    %177 = math.tanh %176 : vector<1x128xf32>
    %178 = arith.mulf %173, %177 : vector<1x128xf32>
    %179 = tpu.concatenate %31, %52, %73, %94, %115, %136, %157, %178 in 0 : vector<1x128xf32>, vector<1x128xf32>, vector<1x128xf32>, vector<1x128xf32>, vector<1x128xf32>, vector<1x128xf32>, vector<1x128xf32>, vector<1x128xf32> -> vector<8x128xf32>
    %c0_40 = arith.constant 0 : index
    %c0_41 = arith.constant 0 : index
    %180 = vector.load %arg4[%c0_40, %c0_41] : memref<1x128xf32, #tpu.memory_space<vmem>>, vector<1x128xf32>
    %181 = vector.broadcast %180 : vector<1x128xf32> to vector<8x128xf32>
    %182 = arith.mulf %179, %181 : vector<8x128xf32>
    %cst_42 = arith.constant dense<0.000000e+00> : vector<8xf32>
    %183 = vector.multi_reduction <add>, %182, %cst_42 [1] : vector<8x128xf32> to vector<8xf32>
    %184 = vector.shape_cast %183 : vector<8xf32> to vector<8x1xf32>
    %c0_43 = arith.constant 0 : index
    %c0_44 = arith.constant 0 : index
    %185 = vector.load %arg5[%c0_43, %c0_44] : memref<1x1xf32, #tpu.memory_space<vmem>>, vector<1x1xf32>
    %186 = vector.broadcast %185 : vector<1x1xf32> to vector<8x1xf32>
    %187 = arith.addf %184, %186 : vector<8x1xf32>
    %c0_45 = arith.constant 0 : index
    %c0_46 = arith.constant 0 : index
    %188 = vector.load %arg6[%c0_45, %c0_46] : memref<8x1xf32, #tpu.memory_space<vmem>>, vector<8x1xf32>
    tpu.vector_store %arg6[%c0_45, %c0_46], %187 {strides = array<i32>} : memref<8x1xf32, #tpu.memory_space<vmem>>, vector<8x1xf32>,
    return
  }
}

</mosaic_0001>

<bundles_post_ra>
// kernel: lstm_forward.1
= control target key start
LH: loop header
LB: loop body
LE: loop exit
PB: predicated region body
PF: predicated region fallthrough
CT: control target
= control target key end

     0   :  { %s2876_s0 = inlined_call_operand.vmem [shape: f32[8,1], index: 0, kind: input, shape index: {}]   ;;  %s2877_s1 = inlined_call_operand.vmem [shape: f32[1,512], index: 1, kind: input, shape index: {}]   ;;  %s2878_s2 = inlined_call_operand.hbm [shape: f32[128,512], index: 2, kind: input, shape index: {}]   ;;  %s2879_s3 = inlined_call_operand.vmem [shape: f32[1,512], index: 3, kind: input, shape index: {}]   ;;  %s2880_s4 = inlined_call_operand.vmem [shape: f32[1,128], index: 4, kind: input, shape index: {}]   ;;  %s2881_s5 = inlined_call_operand.<no memory space> [shape: f32[1,1], index: 5, kind: input, shape index: {}]   ;;  %s2882_s6 = inlined_call_operand.vmem [shape: f32[8,1], index: 6, kind: output, shape index: {}]  }
   0x1   :  { %v11_v0 = vstv %s2881_s5 }
   0x2   :  { %12 = vst [vmem:[#allocation2] sm:$0x1] %v11_v0 }
   0x3   :  { %13 = vsyncpa [#allocation4], 0  ;;  %s1943_s23 = smov [#allocation3]  }
   0x4   :  { %s23_s24 = sshll.u32 %s1943_s23, 4  ;;  %s24_s24 = int_to_ptr.vmem [resolvable:$true] %s23_s24 }
   0x5   :  { %s1929_s25 = scalar_lea.vmem %s24_s24, 8192  ;;  %p1934_p1 = scmp.lt.s32.totalorder %s24_s24, %s24_s24 }
   0x6   :  { %p1930_p0 = scmp.ne.s32.totalorder %s24_s24, %s1929_s25  ;;  %p1935_p2 = scmp.lt.s32.totalorder %s1929_s25, %s1929_s25 }
   0x8   :  { %p1936_p3 = por %p1935_p2, %p1934_p1 }
   0xa   :  { %p1937_p4 = pnand %p1936_p3, %p1930_p0 }
   0xc   :  { %1940 = shalt.err (!%p1937_p4)
}
   0xd   :  { %s1944_s26 = smov 512   ;;  %s1945_s27 = smov 32  }
   0xe   :  { %29 = dma.hbm_to_vmem [thread:$0]  %s2878_s2, 8192, %s24_s24, [#allocation4], %s1944_s26, %s1944_s26, %s1945_s27  }
   0xf   :  { %1941 = dma.done.wait [#allocation4], 8192  }
  0x10   :  { %1942 = vsyncadd [#allocation4], 4294959104  ;;  %v2883_v1 = vmov 0.0   ;;  %v1947_v2 = vmov 0   ;;  %v1991_v3 = vld [vmem:[#allocation3 + $0x1e8] sm:$0xff]  ;;  %v1993_v4 = vld [vmem:[#allocation3 + $0x1f8] sm:$0xff] }
  0x11   :  { %225 = vmatprep.mubr.f32.mxu0 %v2883_v1  ;;  %296 = vmatprep.mubr.f32.mxu1 %v2883_v1  ;;  %2992 = vst [vmem:[#allocation6_spill] sm:$0xff] %v1991_v3  ;;  %2993 = vst [vmem:[#allocation7_spill] sm:$0xff] %v1993_v4  ;;  %v1995_v5 = vld [vmem:[#allocation3 + $0x1e0] sm:$0xff]  ;;  %v1999_v6 = vld [vmem:[#allocation3 + $0x1f0] sm:$0xff]  ;;  %vm1626_vm0 = vcmask 1040384   ;;  %vm1628_vm1 = vcmask 1041408  }
  0x12   :  { %1712 = vset.pattern.permute.xlu0 %v1947_v2  ;;  %161 = vmatprep.subr.mxu0 %v1991_v3  ;;  %v2001_v7 = vld [vmem:[#allocation3 + $0x1c8] sm:$0xff]  ;;  %v2003_v8 = vld [vmem:[#allocation3 + $0x1d8] sm:$0xff]  ;;  %v2007_v9 = vld [vmem:[#allocation3 + $0x1c0] sm:$0xff]  ;;  %vm1630_vm2 = vcmask 1042432   ;;  %vm1632_vm3 = vcmask 1043456   ;;  %vm1634_vm4 = vcmask 1044480  }
  0x13   :  { %232 = vmatprep.subr.mxu1 %v1993_v4  ;;  %162 = vmatpush1.msra.mxu0 %v1995_v5  ;;  %v2009_v10 = vld [vmem:[#allocation3 + $0x1d0] sm:$0xff]  ;;  %v2011_v11 = vld [vmem:[#allocation3 + $0x1a8] sm:$0xff]  ;;  %v2015_v12 = vld [vmem:[#allocation3 + $0x1b8] sm:$0xff]  ;;  %vm1636_vm5 = vcmask 1045504   ;;  %vm1638_vm6 = vcmask 1046528   ;;  %vm1658_vm7 = vcmask 7168  }
  0x14   :  { %233 = vmatpush1.msra.mxu1 %v1999_v6  ;;  %163 = vmatprep.subr.mxu0 %v2001_v7  ;;  %v2017_v13 = vld [vmem:[#allocation3 + $0x1a0] sm:$0xff]  ;;  %v2019_v14 = vld [vmem:[#allocation3 + $0x1b0] sm:$0xff]  ;;  %v2023_v15 = vld [vmem:[#allocation3 + $0x188] sm:$0xff] }
  0x15   :  { %234 = vmatprep.subr.mxu1 %v2003_v8  ;;  %164 = vmatpush1.msra.mxu0 %v2007_v9  ;;  %v2025_v16 = vld [vmem:[#allocation3 + $0x198] sm:$0xff]  ;;  %v2029_v17 = vld [vmem:[#allocation3 + $0x180] sm:$0xff]  ;;  %v2031_v18 = vld [vmem:[#allocation3 + $0x190] sm:$0xff] }
  0x16   :  { %235 = vmatpush1.msra.mxu1 %v2009_v10  ;;  %165 = vmatprep.subr.mxu0 %v2011_v11  ;;  %v2035_v19 = vld [vmem:[#allocation3 + $0x168] sm:$0xff]  ;;  %v2037_v20 = vld [vmem:[#allocation3 + $0x178] sm:$0xff]  ;;  %v2041_v21 = vld [vmem:[#allocation3 + $0x160] sm:$0xff] }
  0x17   :  { %236 = vmatprep.subr.mxu1 %v2015_v12  ;;  %166 = vmatpush1.msra.mxu0 %v2017_v13  ;;  %v2043_v22 = vld [vmem:[#allocation3 + $0x170] sm:$0xff]  ;;  %v2047_v23 = vld [vmem:[#allocation3 + $0x148] sm:$0xff]  ;;  %v2049_v24 = vld [vmem:[#allocation3 + $0x158] sm:$0xff] }
  0x18   :  { %237 = vmatpush1.msra.mxu1 %v2019_v14  ;;  %167 = vmatprep.subr.mxu0 %v2023_v15  ;;  %v2053_v25 = vld [vmem:[#allocation3 + $0x140] sm:$0xff]  ;;  %v2055_v26 = vld [vmem:[#allocation3 + $0x150] sm:$0xff]  ;;  %v2059_v27 = vld [vmem:[#allocation3 + $0x128] sm:$0xff] }
  0x19   :  { %238 = vmatprep.subr.mxu1 %v2025_v16  ;;  %168 = vmatpush1.msra.mxu0 %v2029_v17  ;;  %v2061_v28 = vld [vmem:[#allocation3 + $0x138] sm:$0xff]  ;;  %v2065_v29 = vld [vmem:[#allocation3 + $0x120] sm:$0xff]  ;;  %v2067_v30 = vld [vmem:[#allocation3 + $0x130] sm:$0xff] }
  0x1a   :  { %239 = vmatpush1.msra.mxu1 %v2031_v18  ;;  %169 = vmatprep.subr.mxu0 %v2035_v19  ;;  %v2071_v31 = vld [vmem:[#allocation3 + $0x108] sm:$0xff]  ;;  %v2073_v32 = vld [vmem:[#allocation3 + $0x118] sm:$0xff]  ;;  %v2077_v33 = vld [vmem:[#allocation3 + $0x100] sm:$0xff] }
  0x1b   :  { %240 = vmatprep.subr.mxu1 %v2037_v20  ;;  %170 = vmatpush1.msra.mxu0 %v2041_v21  ;;  %v2079_v34 = vld [vmem:[#allocation3 + $0x110] sm:$0xff]  ;;  %v2083_v35 = vld [vmem:[#allocation3 + $0xe8] sm:$0xff]  ;;  %v2085_v36 = vld [vmem:[#allocation3 + $0xf8] sm:$0xff] }
  0x1c   :  { %241 = vmatpush1.msra.mxu1 %v2043_v22  ;;  %171 = vmatprep.subr.mxu0 %v2047_v23  ;;  %v2089_v37 = vld [vmem:[#allocation3 + $0xe0] sm:$0xff]  ;;  %v2091_v38 = vld [vmem:[#allocation3 + $0xf0] sm:$0xff]  ;;  %v2095_v39 = vld [vmem:[#allocation3 + $0xc8] sm:$0xff] }
  0x1d   :  { %242 = vmatprep.subr.mxu1 %v2049_v24  ;;  %172 = vmatpush1.msra.mxu0 %v2053_v25  ;;  %v2097_v40 = vld [vmem:[#allocation3 + $0xd8] sm:$0xff]  ;;  %v2101_v41 = vld [vmem:[#allocation3 + $0xc0] sm:$0xff]  ;;  %v2103_v42 = vld [vmem:[#allocation3 + $0xd0] sm:$0xff] }
  0x1e   :  { %243 = vmatpush1.msra.mxu1 %v2055_v26  ;;  %173 = vmatprep.subr.mxu0 %v2059_v27  ;;  %v2107_v43 = vld [vmem:[#allocation3 + $0xa8] sm:$0xff]  ;;  %v2109_v44 = vld [vmem:[#allocation3 + $0xb8] sm:$0xff]  ;;  %v2113_v45 = vld [vmem:[#allocation3 + $0xa0] sm:$0xff] }
  0x1f   :  { %244 = vmatprep.subr.mxu1 %v2061_v28  ;;  %174 = vmatpush1.msra.mxu0 %v2065_v29  ;;  %2994 = vst [vmem:[#allocation8_spill] sm:$0xff] %v2109_v44  ;;  %2995 = vst [vmem:[#allocation9_spill] sm:$0xff] %v2113_v45  ;;  %v2115_v46 = vld [vmem:[#allocation3 + $0xb0] sm:$0xff]  ;;  %v2119_v47 = vld [vmem:[#allocation3 + $0x88] sm:$0xff] }
  0x20   :  { %245 = vmatpush1.msra.mxu1 %v2067_v30  ;;  %175 = vmatprep.subr.mxu0 %v2071_v31  ;;  %2996 = vst [vmem:[#allocation10_spill] sm:$0xff] %v2115_v46  ;;  %2997 = vst [vmem:[#allocation11_spill] sm:$0xff] %v2119_v47  ;;  %v2121_v48 = vld [vmem:[#allocation3 + $0x98] sm:$0xff]  ;;  %v2125_v49 = vld [vmem:[#allocation3 + $0x80] sm:$0xff] }
  0x21   :  { %246 = vmatprep.subr.mxu1 %v2073_v32  ;;  %176 = vmatpush1.msra.mxu0 %v2077_v33  ;;  %2998 = vst [vmem:[#allocation12_spill] sm:$0xff] %v2121_v48  ;;  %2999 = vst [vmem:[#allocation13_spill] sm:$0xff] %v2125_v49  ;;  %v2127_v50 = vld [vmem:[#allocation3 + $0x90] sm:$0xff]  ;;  %v2131_v51 = vld [vmem:[#allocation3 + $0x68] sm:$0xff] }
  0x22   :  { %247 = vmatpush1.msra.mxu1 %v2079_v34  ;;  %177 = vmatprep.subr.mxu0 %v2083_v35  ;;  %3000 = vst [vmem:[#allocation14_spill] sm:$0xff] %v2127_v50  ;;  %3001 = vst [vmem:[#allocation15_spill] sm:$0xff] %v2131_v51  ;;  %v2133_v52 = vld [vmem:[#allocation3 + $0x78] sm:$0xff]  ;;  %v2137_v53 = vld [vmem:[#allocation3 + $0x60] sm:$0xff] }
  0x23   :  { %248 = vmatprep.subr.mxu1 %v2085_v36  ;;  %178 = vmatpush1.msra.mxu0 %v2089_v37  ;;  %3002 = vst [vmem:[#allocation16_spill] sm:$0xff] %v2133_v52  ;;  %3003 = vst [vmem:[#allocation17_spill] sm:$0xff] %v2137_v53  ;;  %v2139_v54 = vld [vmem:[#allocation3 + $0x70] sm:$0xff]  ;;  %v2143_v55 = vld [vmem:[#allocation3 + $0x48] sm:$0xff] }
  0x24   :  { %249 = vmatpush1.msra.mxu1 %v2091_v38  ;;  %179 = vmatprep.subr.mxu0 %v2095_v39  ;;  %3004 = vst [vmem:[#allocation18_spill] sm:$0xff] %v2139_v54  ;;  %3005 = vst [vmem:[#allocation19_spill] sm:$0xff] %v2143_v55  ;;  %v2145_v56 = vld [vmem:[#allocation3 + $0x58] sm:$0xff]  ;;  %v2149_v57 = vld [vmem:[#allocation3 + $0x40] sm:$0xff] }
  0x25   :  { %250 = vmatprep.subr.mxu1 %v2097_v40  ;;  %180 = vmatpush1.msra.mxu0 %v2101_v41  ;;  %3006 = vst [vmem:[#allocation20_spill] sm:$0xff] %v2145_v56  ;;  %3007 = vst [vmem:[#allocation21_spill] sm:$0xff] %v2149_v57  ;;  %v2151_v58 = vld [vmem:[#allocation3 + $0x50] sm:$0xff]  ;;  %v2155_v59 = vld [vmem:[#allocation3 + $0x28] sm:$0xff] }
  0x26   :  { %251 = vmatpush1.msra.mxu1 %v2103_v42  ;;  %181 = vmatprep.subr.mxu0 %v2107_v43  ;;  %3008 = vst [vmem:[#allocation22_spill] sm:$0xff] %v2151_v58  ;;  %3009 = vst [vmem:[#allocation23_spill] sm:$0xff] %v2155_v59  ;;  %v2157_v60 = vld [vmem:[#allocation3 + $0x38] sm:$0xff]  ;;  %v2161_v61 = vld [vmem:[#allocation3 + $0x20] sm:$0xff] }
  0x27   :  { %252 = vmatprep.subr.mxu1 %v2109_v44  ;;  %182 = vmatpush1.msra.mxu0 %v2113_v45  ;;  %3010 = vst [vmem:[#allocation24_spill] sm:$0xff] %v2157_v60  ;;  %3011 = vst [vmem:[#allocation25_spill] sm:$0xff] %v2161_v61  ;;  %v2163_v62 = vld [vmem:[#allocation3 + $0x30] sm:$0xff]  ;;  %v2167_v63 = vld [vmem:[#allocation3 + $0x8] sm:$0xff] }
  0x28   :  { %253 = vmatpush1.msra.mxu1 %v2115_v46  ;;  %183 = vmatprep.subr.mxu0 %v2119_v47  ;;  %3012 = vst [vmem:[#allocation26_spill] sm:$0xff] %v2163_v62  ;;  %3013 = vst [vmem:[#allocation27_spill] sm:$0xff] %v2167_v63  ;;  %v2169_v0 = vld [vmem:[#allocation3 + $0x18] sm:$0xff]  ;;  %v2173_v2 = vld [vmem:[#allocation3] sm:$0xff] }
  0x29   :  { %254 = vmatprep.subr.mxu1 %v2121_v48  ;;  %184 = vmatpush1.msra.mxu0 %v2125_v49  ;;  %3014 = vst [vmem:[#allocation28_spill] sm:$0xff] %v2169_v0  ;;  %3015 = vst [vmem:[#allocation29_spill] sm:$0xff] %v2173_v2  ;;  %v2175_v1 = vld [vmem:[#allocation3 + $0x10] sm:$0xff] }
  0x2a   :  { %255 = vmatpush1.msra.mxu1 %v2127_v50  ;;  %185 = vmatprep.subr.mxu0 %v2131_v51  ;;  %3016 = vst [vmem:[#allocation30_spill] sm:$0xff] %v2175_v1 }
  0x2b   :  { %256 = vmatprep.subr.mxu1 %v2133_v52  ;;  %186 = vmatpush1.msra.mxu0 %v2137_v53 }
  0x2c   :  { %257 = vmatpush1.msra.mxu1 %v2139_v54  ;;  %187 = vmatprep.subr.mxu0 %v2143_v55 }
  0x2d   :  { %258 = vmatprep.subr.mxu1 %v2145_v56  ;;  %188 = vmatpush1.msra.mxu0 %v2149_v57 }
  0x2e   :  { %259 = vmatpush1.msra.mxu1 %v2151_v58  ;;  %189 = vmatprep.subr.mxu0 %v2155_v59  ;;  %v103_v58 = vld [vmem:[%s2876_s0] sm:$0xff] }
  0x2f   :  { %260 = vmatprep.subr.mxu1 %v2157_v60  ;;  %190 = vmatpush1.msra.mxu0 %v2161_v61  ;;  %v3017_v60 = vmov 0.0  }
  0x30   :  { %261 = vmatpush1.msra.mxu1 %v2163_v62  ;;  %191 = vmatprep.subr.mxu0 %v2167_v63 }
  0x31   :  { %262 = vmatprep.subr.mxu1 %v2169_v0  ;;  %192 = vmatpush1.msra.mxu0 %v2173_v2 }
  0x32   :  { %263 = vmatpush1.msra.mxu1 %v2175_v1  ;;  %226 = vmatmul.mubr.f32.vlgmr.msra.gmra.mxu0 %v3017_v60 }
  0x33   :  { %297 = vmatmul.mubr.f32.vlgmr.msra.gmra.mxu1 %v3017_v60  ;;  %107 = vperm.xlu0 %1712, %v103_v58   ;;  %v3018_v58 = vld [vmem:[#allocation22_spill] sm:$0xff] }
  0x34   :  { %346 = vmatprep.subr.mxu0 %v1991_v3  ;;  %417 = vmatprep.subr.mxu1 %v1993_v4 }
  0x35   :  { %347 = vmatpush1.msra.mxu0 %v1995_v5  ;;  %418 = vmatpush1.msra.mxu1 %v1999_v6 }
  0x36   :  { %348 = vmatprep.subr.mxu0 %v2001_v7  ;;  %419 = vmatprep.subr.mxu1 %v2003_v8 }
  0x37   :  { %349 = vmatpush1.msra.mxu0 %v2007_v9  ;;  %420 = vmatpush1.msra.mxu1 %v2009_v10 }
  0x38   :  { %350 = vmatprep.subr.mxu0 %v2011_v11  ;;  %421 = vmatprep.subr.mxu1 %v2015_v12 }
  0x39   :  { %351 = vmatpush1.msra.mxu0 %v2017_v13  ;;  %422 = vmatpush1.msra.mxu1 %v2019_v14 }
  0x3a   :  { %352 = vmatprep.subr.mxu0 %v2023_v15  ;;  %423 = vmatprep.subr.mxu1 %v2025_v16 }
  0x3b   :  { %353 = vmatpush1.msra.mxu0 %v2029_v17  ;;  %424 = vmatpush1.msra.mxu1 %v2031_v18 }
  0x3c   :  { %354 = vmatprep.subr.mxu0 %v2035_v19  ;;  %425 = vmatprep.subr.mxu1 %v2037_v20 }
  0x3d   :  { %355 = vmatpush1.msra.mxu0 %v2041_v21  ;;  %426 = vmatpush1.msra.mxu1 %v2043_v22 }
  0x3e   :  { %356 = vmatprep.subr.mxu0 %v2047_v23  ;;  %427 = vmatprep.subr.mxu1 %v2049_v24 }
  0x3f   :  { %357 = vmatpush1.msra.mxu0 %v2053_v25  ;;  %428 = vmatpush1.msra.mxu1 %v2055_v26 }
  0x40   :  { %358 = vmatprep.subr.mxu0 %v2059_v27  ;;  %429 = vmatprep.subr.mxu1 %v2061_v28 }
  0x41   :  { %359 = vmatpush1.msra.mxu0 %v2065_v29  ;;  %430 = vmatpush1.msra.mxu1 %v2067_v30 }
  0x42   :  { %360 = vmatprep.subr.mxu0 %v2071_v31  ;;  %431 = vmatprep.subr.mxu1 %v2073_v32 }
  0x43   :  { %361 = vmatpush1.msra.mxu0 %v2077_v33  ;;  %432 = vmatpush1.msra.mxu1 %v2079_v34 }
  0x44   :  { %362 = vmatprep.subr.mxu0 %v2083_v35  ;;  %433 = vmatprep.subr.mxu1 %v2085_v36 }
  0x45   :  { %363 = vmatpush1.msra.mxu0 %v2089_v37  ;;  %434 = vmatpush1.msra.mxu1 %v2091_v38 }
  0x46   :  { %364 = vmatprep.subr.mxu0 %v2095_v39  ;;  %435 = vmatprep.subr.mxu1 %v2097_v40 }
  0x47   :  { %365 = vmatpush1.msra.mxu0 %v2101_v41  ;;  %436 = vmatpush1.msra.mxu1 %v2103_v42 }
  0x48   :  { %366 = vmatprep.subr.mxu0 %v2107_v43  ;;  %437 = vmatprep.subr.mxu1 %v2109_v44 }
  0x49   :  { %367 = vmatpush1.msra.mxu0 %v2113_v45  ;;  %438 = vmatpush1.msra.mxu1 %v2115_v46 }
  0x4a   :  { %368 = vmatprep.subr.mxu0 %v2119_v47  ;;  %439 = vmatprep.subr.mxu1 %v2121_v48 }
  0x4b   :  { %369 = vmatpush1.msra.mxu0 %v2125_v49  ;;  %440 = vmatpush1.msra.mxu1 %v2127_v50  ;;  %v3019_v49 = vld [vmem:[#allocation24_spill] sm:$0xff] }
  0x4c   :  { %370 = vmatprep.subr.mxu0 %v2131_v51  ;;  %441 = vmatprep.subr.mxu1 %v2133_v52 }
  0x4d   :  { %371 = vmatpush1.msra.mxu0 %v2137_v53  ;;  %442 = vmatpush1.msra.mxu1 %v2139_v54 }
  0x4e   :  { %372 = vmatprep.subr.mxu0 %v2143_v55  ;;  %443 = vmatprep.subr.mxu1 %v2145_v56 }
  0x4f   :  { %373 = vmatpush1.msra.mxu0 %v2149_v57  ;;  %444 = vmatpush1.msra.mxu1 %v3018_v58 }
  0x50   :  { %374 = vmatprep.subr.mxu0 %v2155_v59  ;;  %445 = vmatprep.subr.mxu1 %v3019_v49  ;;  %v111_v49 = vlaneseq }
  0x51   :  { %375 = vmatpush1.msra.mxu0 %v2161_v61  ;;  %446 = vmatpush1.msra.mxu1 %v2163_v62 }
  0x52   :  { %376 = vmatprep.subr.mxu0 %v2167_v63  ;;  %447 = vmatprep.subr.mxu1 %v2169_v0  ;;  %v112_v61 = vshrl.u32 %v111_v49, 7  ;;  %v104_v0 = vld [vmem:[%s2877_s1] sm:$0xf] }
  0x53   :  { %377 = vmatpush1.msra.mxu0 %v2173_v2  ;;  %410 = vmatprep.mubr.f32.mxu0 %v3017_v60 }
  0x54   :  { %448 = vmatpush1.msra.mxu1 %v2175_v1  ;;  %481 = vmatprep.mubr.f32.mxu1 %v3017_v60  ;;  %v113_v59 = vsub.s32 0, %v112_v61  ;;  %v121_v62 = vsub.s32 2, %v112_v61  ;;  %v117_v63 = vsub.s32 1, %v112_v61  ;;  %v135_v1 = vld [vmem:[%s2879_s3] sm:$0xf]  ;;  %v125_v48 = vsub.s32 3, %v112_v61 }
  0x55   :  { %527 = vmatprep.subr.mxu0 %v1991_v3  ;;  %598 = vmatprep.subr.mxu1 %v1993_v4 }
  0x56   :  { %v114_v2 = vrot.slane %v104_v0, %v113_v59  ;;  %v122_v58 = vrot.slane %v104_v0, %v121_v62  ;;  %v118_v57 = vrot.slane %v104_v0, %v117_v63  ;;  %v140_v3 = vrot.slane %v135_v1, %v113_v59 }
  0x57   :  { %v148_v56 = vrot.slane %v135_v1, %v121_v62  ;;  %v144_v49 = vrot.slane %v135_v1, %v117_v63  ;;  %v126_v63 = vrot.slane %v104_v0, %v125_v48 }
  0xae   :  { %v108_v60 = vpop.permute.xlu0 %107 }
  0xaf   :  { %v131_v4 = vmul.f32 %v114_v2, %v108_v60  ;;  %v133_v55 = vmul.f32 %v122_v58, %v108_v60  ;;  %v132_v54 = vmul.f32 %v118_v57, %v108_v60 }
  0xb1   :  { %v2262_v53 = vadd.f32 %v140_v3, %v131_v4  ;;  %v2264_v52 = vadd.f32 %v148_v56, %v133_v55  ;;  %v2266_v47 = vadd.f32 %v144_v49, %v132_v54  ;;  %v152_v4 = vrot.slane %v135_v1, %v125_v48 }
  0xb2   :  { %v134_v55 = vmul.f32 %v126_v63, %v108_v60 }
  0xb3   :  { %3020 = vst [vmem:[#allocation31_spill] sm:$0xff] %v2262_v53  ;;  %3021 = vst [vmem:[#allocation32_spill] sm:$0xff] %v2264_v52 }
  0xb4   :  { %v2271_v57 = vadd.f32 %v152_v4, %v134_v55 }
  0xf2   :  { %v227_v51 = vpop.f32.mrf.mxu0 }
  0xf3   :  { %v298_v50 = vpop.f32.mrf.mxu1  ;;  %v228_v46 = vadd.f32 %v227_v51, %v2262_v53 }
  0xf4   :  { %v299_v45 = vadd.f32 %v298_v50, %v2264_v52  ;;  %v229_v44 = vpop.f32.mrf.mxu0 }
  0xf5   :  { %v1665_v59 = vmul.f32 -1.442695, %v228_v46  ;;  %v230_v2 = vadd.f32 %v229_v44, %v2266_v47  ;;  %v300_v56 = vpop.f32.mrf.mxu1 }
  0xf6   :  { %v1667_v62 = vmul.f32 -1.442695, %v299_v45  ;;  %v301_v54 = vadd.f32 %v300_v56, %v2271_v57 }
  0xf7   :  { %1713 = vpow2.f32 %v1665_v59  ;;  %v1666_v3 = vmul.f32 -1.442695, %v230_v2 }
  0xf8   :  { %1715 = vpow2.f32 %v1667_v62  ;;  %v1668_v50 = vmul.f32 -1.442695, %v301_v54  ;;  %v3023_v54 = vld [vmem:[#allocation8_spill] sm:$0xff] }
  0xf9   :  { %1717 = vpow2.f32 %v1666_v3 }
 0x104   :  { %v1714_v51 = vpop.eup %1713 }
 0x105   :  { %v1716_v61 = vpop.eup %1715  ;;  %v315_v49 = vadd.f32 1.0, %v1714_v51  ;;  %v3024_v51 = vld [vmem:[#allocation9_spill] sm:$0xff] }
 0x106   :  { %v1718_v58 = vpop.eup %1717  ;;  %v317_v46 = vadd.f32 1.0, %v1716_v61  ;;  %v3025_v61 = vld [vmem:[#allocation10_spill] sm:$0xff] }
 0x107   :  { %v316_v45 = vadd.f32 1.0, %v1718_v58  ;;  %v3027_v58 = vld [vmem:[#allocation12_spill] sm:$0xff] }
 0x108   :  { %1719 = vrcp.f32 %v317_v46  ;;  %v3028_v46 = vld [vmem:[#allocation13_spill] sm:$0xff] }
 0x109   :  { %1721 = vpow2.f32 %v1668_v50  ;;  %v3026_v50 = vld [vmem:[#allocation11_spill] sm:$0xff] }
 0x10a   :  { %1723 = vrcp.f32 %v316_v45  ;;  %v3029_v45 = vld [vmem:[#allocation14_spill] sm:$0xff] }
 0x10b   :  { %1725 = vrcp.f32 %v315_v49  ;;  %v3030_v49 = vld [vmem:[#allocation15_spill] sm:$0xff] }
 0x115   :  { %v1720_v44 = vpop.eup %1719 }
 0x116   :  { %v1722_v0 = vpop.eup %1721  ;;  %v327_v1 = vmul.f32 2.0, %v1720_v44  ;;  %v3031_v44 = vld [vmem:[#allocation16_spill] sm:$0xff] }
 0x117   :  { %v1724_v48 = vpop.eup %1723  ;;  %v318_v62 = vadd.f32 1.0, %v1722_v0  ;;  %v3032_v0 = vld [vmem:[#allocation17_spill] sm:$0xff] }
 0x118   :  { %v1669_v60 = vadd.f32 -1.0, %v327_v1  ;;  %v1726_v59 = vpop.eup %1725  ;;  %v329_v63 = vmul.f32 0.0, %v1724_v48  ;;  %v3033_v1 = vld [vmem:[#allocation18_spill] sm:$0xff]  ;;  %v3034_v48 = vld [vmem:[#allocation19_spill] sm:$0xff] }
 0x119   :  { %1727 = vrcp.f32 %v318_v62  ;;  %v3037_v62 = vld [vmem:[#allocation22_spill] sm:$0xff] }
 0x11a   :  { %v330_v2 = vmul.f32 %v1726_v59, %v1669_v60  ;;  %v3035_v60 = vld [vmem:[#allocation20_spill] sm:$0xff]  ;;  %v3036_v59 = vld [vmem:[#allocation21_spill] sm:$0xff] }
 0x11c   :  { %v2274_v3 = vadd.f32 %v330_v2, %v329_v63  ;;  %v3038_v2 = vld [vmem:[#allocation23_spill] sm:$0xff]  ;;  %v3039_v63 = vld [vmem:[#allocation24_spill] sm:$0xff] }
 0x11e   :  { %1729 = vtanh.f32 %v2274_v3 }
 0x126   :  { %v1728_v4 = vpop.eup %1727 }
 0x12b   :  { %v1730_v55 = vpop.eup %1729 }
 0x12c   :  { %v2277_v56 = vmul.f32 %v1730_v55, %v1728_v4  ;;  %v3040_v4 = vld [vmem:[#allocation25_spill] sm:$0xff]  ;;  %v3041_v55 = vld [vmem:[#allocation26_spill] sm:$0xff] }
 0x12e   :  { %3022 = vst [vmem:[#allocation33_spill] sm:$0xff] %v2277_v56  ;;  %411 = vmatmul.mubr.f32.vlgmr.msra.gmra.mxu0 %v2277_v56  ;;  %482 = vmatmul.mubr.f32.vlgmr.msra.gmra.mxu1 %v2277_v56  ;;  %v3042_v56 = vld [vmem:[#allocation27_spill] sm:$0xff] }
 0x12f   :  { %528 = vmatpush1.msra.mxu0 %v1995_v5  ;;  %599 = vmatpush1.msra.mxu1 %v1999_v6 }
 0x130   :  { %529 = vmatprep.subr.mxu0 %v2001_v7  ;;  %600 = vmatprep.subr.mxu1 %v2003_v8 }
 0x131   :  { %530 = vmatpush1.msra.mxu0 %v2007_v9  ;;  %601 = vmatpush1.msra.mxu1 %v2009_v10 }
 0x132   :  { %531 = vmatprep.subr.mxu0 %v2011_v11  ;;  %602 = vmatprep.subr.mxu1 %v2015_v12 }
 0x133   :  { %532 = vmatpush1.msra.mxu0 %v2017_v13  ;;  %603 = vmatpush1.msra.mxu1 %v2019_v14 }
 0x134   :  { %533 = vmatprep.subr.mxu0 %v2023_v15  ;;  %604 = vmatprep.subr.mxu1 %v2025_v16 }
 0x135   :  { %534 = vmatpush1.msra.mxu0 %v2029_v17  ;;  %605 = vmatpush1.msra.mxu1 %v2031_v18 }
 0x136   :  { %535 = vmatprep.subr.mxu0 %v2035_v19  ;;  %606 = vmatprep.subr.mxu1 %v2037_v20 }
 0x137   :  { %536 = vmatpush1.msra.mxu0 %v2041_v21  ;;  %607 = vmatpush1.msra.mxu1 %v2043_v22 }
 0x138   :  { %537 = vmatprep.subr.mxu0 %v2047_v23  ;;  %608 = vmatprep.subr.mxu1 %v2049_v24 }
 0x139   :  { %538 = vmatpush1.msra.mxu0 %v2053_v25  ;;  %609 = vmatpush1.msra.mxu1 %v2055_v26 }
 0x13a   :  { %539 = vmatprep.subr.mxu0 %v2059_v27  ;;  %610 = vmatprep.subr.mxu1 %v2061_v28 }
 0x13b   :  { %540 = vmatpush1.msra.mxu0 %v2065_v29  ;;  %611 = vmatpush1.msra.mxu1 %v2067_v30 }
 0x13c   :  { %541 = vmatprep.subr.mxu0 %v2071_v31  ;;  %612 = vmatprep.subr.mxu1 %v2073_v32 }
 0x13d   :  { %542 = vmatpush1.msra.mxu0 %v2077_v33  ;;  %613 = vmatpush1.msra.mxu1 %v2079_v34 }
 0x13e   :  { %543 = vmatprep.subr.mxu0 %v2083_v35  ;;  %614 = vmatprep.subr.mxu1 %v2085_v36 }
 0x13f   :  { %544 = vmatpush1.msra.mxu0 %v2089_v37  ;;  %615 = vmatpush1.msra.mxu1 %v2091_v38 }
 0x140   :  { %545 = vmatprep.subr.mxu0 %v2095_v39  ;;  %616 = vmatprep.subr.mxu1 %v2097_v40 }
 0x141   :  { %546 = vmatpush1.msra.mxu0 %v2101_v41  ;;  %617 = vmatpush1.msra.mxu1 %v2103_v42 }
 0x142   :  { %547 = vmatprep.subr.mxu0 %v2107_v43  ;;  %618 = vmatprep.subr.mxu1 %v3023_v54 }
 0x143   :  { %548 = vmatpush1.msra.mxu0 %v3024_v51  ;;  %619 = vmatpush1.msra.mxu1 %v3025_v61 }
 0x144   :  { %549 = vmatprep.subr.mxu0 %v3026_v50  ;;  %620 = vmatprep.subr.mxu1 %v3027_v58 }
 0x145   :  { %550 = vmatpush1.msra.mxu0 %v3028_v46  ;;  %621 = vmatpush1.msra.mxu1 %v3029_v45 }
 0x146   :  { %551 = vmatprep.subr.mxu0 %v3030_v49  ;;  %622 = vmatprep.subr.mxu1 %v3031_v44 }
 0x147   :  { %552 = vmatpush1.msra.mxu0 %v3032_v0  ;;  %623 = vmatpush1.msra.mxu1 %v3033_v1  ;;  %v3043_v0 = vld [vmem:[#allocation28_spill] sm:$0xff]  ;;  %v3044_v1 = vld [vmem:[#allocation29_spill] sm:$0xff] }
 0x148   :  { %553 = vmatprep.subr.mxu0 %v3034_v48  ;;  %624 = vmatprep.subr.mxu1 %v3035_v60  ;;  %v3045_v48 = vmov 0.0   ;;  %v3046_v60 = vld [vmem:[#allocation30_spill] sm:$0xff] }
 0x149   :  { %554 = vmatpush1.msra.mxu0 %v3036_v59  ;;  %625 = vmatpush1.msra.mxu1 %v3037_v62  ;;  %v3047_v62 = vld [vmem:[#allocation6_spill] sm:$0xff] }
 0x14a   :  { %555 = vmatprep.subr.mxu0 %v3038_v2  ;;  %626 = vmatprep.subr.mxu1 %v3039_v63  ;;  %v3048_v2 = vld [vmem:[#allocation7_spill] sm:$0xff] }
 0x14b   :  { %556 = vmatpush1.msra.mxu0 %v3040_v4  ;;  %627 = vmatpush1.msra.mxu1 %v3041_v55  ;;  %v338_v4 = vrot.slane %v2262_v53, 1  ;;  %v340_v55 = vrot.slane %v2264_v52, 1 }
 0x14c   :  { %557 = vmatprep.subr.mxu0 %v3042_v56  ;;  %628 = vmatprep.subr.mxu1 %v3043_v0 }
 0x14d   :  { %558 = vmatpush1.msra.mxu0 %v3044_v1  ;;  %591 = vmatprep.mubr.f32.mxu0 %v3045_v48  ;;  %v339_v1 = vrot.slane %v2266_v47, 1 }
 0x14e   :  { %629 = vmatpush1.msra.mxu1 %v3046_v60  ;;  %662 = vmatprep.mubr.f32.mxu1 %v3045_v48 }
 0x14f   :  { %708 = vmatprep.subr.mxu0 %v3047_v62  ;;  %779 = vmatprep.subr.mxu1 %v3048_v2  ;;  %v341_v2 = vrot.slane %v2271_v57, 1 }
 0x1ee   :  { %v412_v63 = vpop.f32.mrf.mxu0  ;;  %v483_v56 = vpop.f32.mrf.mxu1 }
 0x1ef   :  { %v413_v59 = vadd.f32 %v412_v63, %v338_v4  ;;  %v484_v0 = vadd.f32 %v483_v56, %v340_v55  ;;  %v3052_v55 = vld [vmem:[#allocation14_spill] sm:$0xff] }
 0x1f0   :  { %v414_v44 = vpop.f32.mrf.mxu0  ;;  %v485_v62 = vpop.f32.mrf.mxu1 }
 0x1f1   :  { %v1670_v49 = vmul.f32 -1.442695, %v413_v59  ;;  %v1672_v45 = vmul.f32 -1.442695, %v484_v0  ;;  %v415_v60 = vadd.f32 %v414_v44, %v339_v1  ;;  %v486_v53 = vadd.f32 %v485_v62, %v341_v2 }
 0x1f3   :  { %1731 = vpow2.f32 %v1670_v49  ;;  %v1671_v48 = vmul.f32 -1.442695, %v415_v60  ;;  %v1673_v58 = vmul.f32 -1.442695, %v486_v53 }
 0x1f4   :  { %1733 = vpow2.f32 %v1672_v45 }
 0x1f5   :  { %1735 = vpow2.f32 %v1671_v48 }
 0x200   :  { %v1732_v46 = vpop.eup %1731 }
 0x201   :  { %v1734_v52 = vpop.eup %1733  ;;  %v500_v4 = vadd.f32 1.0, %v1732_v46  ;;  %v3051_v46 = vld [vmem:[#allocation13_spill] sm:$0xff] }
 0x202   :  { %v1736_v50 = vpop.eup %1735  ;;  %v502_v63 = vadd.f32 1.0, %v1734_v52 }
 0x203   :  { %v501_v56 = vadd.f32 1.0, %v1736_v50 }
 0x204   :  { %1737 = vrcp.f32 %v502_v63  ;;  %v3053_v63 = vld [vmem:[#allocation15_spill] sm:$0xff] }
 0x205   :  { %1739 = vpow2.f32 %v1673_v58  ;;  %v3050_v58 = vld [vmem:[#allocation12_spill] sm:$0xff] }
 0x206   :  { %1741 = vrcp.f32 %v501_v56  ;;  %v3054_v56 = vld [vmem:[#allocation16_spill] sm:$0xff] }
 0x207   :  { %1743 = vrcp.f32 %v500_v4  ;;  %v3055_v4 = vld [vmem:[#allocation17_spill] sm:$0xff] }
 0x211   :  { %v1738_v44 = vpop.eup %1737 }
 0x212   :  { %v1740_v49 = vpop.eup %1739  ;;  %v512_v0 = vmul.f32 2.0, %v1738_v44  ;;  %v3056_v44 = vld [vmem:[#allocation18_spill] sm:$0xff] }
 0x213   :  { %v1742_v45 = vpop.eup %1741  ;;  %v503_v60 = vadd.f32 1.0, %v1740_v49  ;;  %v3057_v49 = vld [vmem:[#allocation19_spill] sm:$0xff] }
 0x214   :  { %v1674_v1 = vadd.f32 -1.0, %v512_v0  ;;  %v1744_v48 = vpop.eup %1743  ;;  %v514_v62 = vmul.f32 %v1742_v45, %v2274_v3  ;;  %v3049_v3 = vld [vmem:[#allocation11_spill] sm:$0xff]  ;;  %v3058_v0 = vld [vmem:[#allocation20_spill] sm:$0xff]  ;;  %v3059_v45 = vld [vmem:[#allocation21_spill] sm:$0xff] }
 0x215   :  { %1745 = vrcp.f32 %v503_v60  ;;  %v3062_v60 = vld [vmem:[#allocation24_spill] sm:$0xff] }
 0x216   :  { %v515_v59 = vmul.f32 %v1744_v48, %v1674_v1  ;;  %v3060_v1 = vld [vmem:[#allocation22_spill] sm:$0xff]  ;;  %v3061_v48 = vld [vmem:[#allocation23_spill] sm:$0xff] }
 0x218   :  { %v2352_v2 = vadd.f32 %v515_v59, %v514_v62  ;;  %v3063_v59 = vld [vmem:[#allocation25_spill] sm:$0xff]  ;;  %v3064_v62 = vld [vmem:[#allocation26_spill] sm:$0xff] }
 0x21a   :  { %1747 = vtanh.f32 %v2352_v2 }
 0x222   :  { %v1746_v52 = vpop.eup %1745 }
 0x227   :  { %v1748_v53 = vpop.eup %1747 }
 0x228   :  { %v2355_v50 = vmul.f32 %v1748_v53, %v1746_v52  ;;  %v3065_v52 = vld [vmem:[#allocation27_spill] sm:$0xff]  ;;  %v3066_v53 = vld [vmem:[#allocation28_spill] sm:$0xff] }
 0x22a   :  { %592 = vmatmul.mubr.f32.vlgmr.msra.gmra.mxu0 %v2355_v50  ;;  %663 = vmatmul.mubr.f32.vlgmr.msra.gmra.mxu1 %v2355_v50 }
 0x22b   :  { %709 = vmatpush1.msra.mxu0 %v1995_v5  ;;  %780 = vmatpush1.msra.mxu1 %v1999_v6 }
 0x22c   :  { %710 = vmatprep.subr.mxu0 %v2001_v7  ;;  %781 = vmatprep.subr.mxu1 %v2003_v8 }
 0x22d   :  { %711 = vmatpush1.msra.mxu0 %v2007_v9  ;;  %782 = vmatpush1.msra.mxu1 %v2009_v10 }
 0x22e   :  { %712 = vmatprep.subr.mxu0 %v2011_v11  ;;  %783 = vmatprep.subr.mxu1 %v2015_v12 }
 0x22f   :  { %713 = vmatpush1.msra.mxu0 %v2017_v13  ;;  %784 = vmatpush1.msra.mxu1 %v2019_v14 }
 0x230   :  { %714 = vmatprep.subr.mxu0 %v2023_v15  ;;  %785 = vmatprep.subr.mxu1 %v2025_v16 }
 0x231   :  { %715 = vmatpush1.msra.mxu0 %v2029_v17  ;;  %786 = vmatpush1.msra.mxu1 %v2031_v18 }
 0x232   :  { %716 = vmatprep.subr.mxu0 %v2035_v19  ;;  %787 = vmatprep.subr.mxu1 %v2037_v20 }
 0x233   :  { %717 = vmatpush1.msra.mxu0 %v2041_v21  ;;  %788 = vmatpush1.msra.mxu1 %v2043_v22 }
 0x234   :  { %718 = vmatprep.subr.mxu0 %v2047_v23  ;;  %789 = vmatprep.subr.mxu1 %v2049_v24 }
 0x235   :  { %719 = vmatpush1.msra.mxu0 %v2053_v25  ;;  %790 = vmatpush1.msra.mxu1 %v2055_v26 }
 0x236   :  { %720 = vmatprep.subr.mxu0 %v2059_v27  ;;  %791 = vmatprep.subr.mxu1 %v2061_v28 }
 0x237   :  { %721 = vmatpush1.msra.mxu0 %v2065_v29  ;;  %792 = vmatpush1.msra.mxu1 %v2067_v30 }
 0x238   :  { %722 = vmatprep.subr.mxu0 %v2071_v31  ;;  %793 = vmatprep.subr.mxu1 %v2073_v32 }
 0x239   :  { %723 = vmatpush1.msra.mxu0 %v2077_v33  ;;  %794 = vmatpush1.msra.mxu1 %v2079_v34 }
 0x23a   :  { %724 = vmatprep.subr.mxu0 %v2083_v35  ;;  %795 = vmatprep.subr.mxu1 %v2085_v36 }
 0x23b   :  { %725 = vmatpush1.msra.mxu0 %v2089_v37  ;;  %796 = vmatpush1.msra.mxu1 %v2091_v38 }
 0x23c   :  { %726 = vmatprep.subr.mxu0 %v2095_v39  ;;  %797 = vmatprep.subr.mxu1 %v2097_v40 }
 0x23d   :  { %727 = vmatpush1.msra.mxu0 %v2101_v41  ;;  %798 = vmatpush1.msra.mxu1 %v2103_v42 }
 0x23e   :  { %728 = vmatprep.subr.mxu0 %v2107_v43  ;;  %799 = vmatprep.subr.mxu1 %v3023_v54 }
 0x23f   :  { %729 = vmatpush1.msra.mxu0 %v3024_v51  ;;  %800 = vmatpush1.msra.mxu1 %v3025_v61 }
 0x240   :  { %730 = vmatprep.subr.mxu0 %v3049_v3  ;;  %801 = vmatprep.subr.mxu1 %v3050_v58 }
 0x241   :  { %731 = vmatpush1.msra.mxu0 %v3051_v46  ;;  %802 = vmatpush1.msra.mxu1 %v3052_v55 }
 0x242   :  { %732 = vmatprep.subr.mxu0 %v3053_v63  ;;  %803 = vmatprep.subr.mxu1 %v3054_v56 }
 0x243   :  { %733 = vmatpush1.msra.mxu0 %v3055_v4  ;;  %804 = vmatpush1.msra.mxu1 %v3056_v44  ;;  %v3067_v44 = vld [vmem:[#allocation29_spill] sm:$0xff] }
 0x244   :  { %734 = vmatprep.subr.mxu0 %v3057_v49  ;;  %805 = vmatprep.subr.mxu1 %v3058_v0  ;;  %v3068_v49 = vmov 0.0   ;;  %v3069_v0 = vld [vmem:[#allocation30_spill] sm:$0xff] }
 0x245   :  { %735 = vmatpush1.msra.mxu0 %v3059_v45  ;;  %806 = vmatpush1.msra.mxu1 %v3060_v1  ;;  %v3070_v1 = vld [vmem:[#allocation6_spill] sm:$0xff]  ;;  %v3073_v45 = vld [vmem:[#allocation32_spill] sm:$0xff] }
 0x246   :  { %736 = vmatprep.subr.mxu0 %v3061_v48  ;;  %807 = vmatprep.subr.mxu1 %v3062_v60  ;;  %v3071_v48 = vld [vmem:[#allocation7_spill] sm:$0xff] }
 0x247   :  { %737 = vmatpush1.msra.mxu0 %v3063_v59  ;;  %808 = vmatpush1.msra.mxu1 %v3064_v62  ;;  %v3072_v60 = vld [vmem:[#allocation31_spill] sm:$0xff]  ;;  %v521_v62 = vrot.slane %v3073_v45, 2 }
 0x248   :  { %738 = vmatprep.subr.mxu0 %v3065_v52  ;;  %809 = vmatprep.subr.mxu1 %v3066_v53  ;;  %v519_v59 = vrot.slane %v3072_v60, 2 }
 0x249   :  { %739 = vmatpush1.msra.mxu0 %v3067_v44  ;;  %772 = vmatprep.mubr.f32.mxu0 %v3068_v49  ;;  %v520_v44 = vrot.slane %v2266_v47, 2 }
 0x24a   :  { %810 = vmatpush1.msra.mxu1 %v3069_v0  ;;  %843 = vmatprep.mubr.f32.mxu1 %v3068_v49 }
 0x24b   :  { %889 = vmatprep.subr.mxu0 %v3070_v1  ;;  %960 = vmatprep.subr.mxu1 %v3071_v48  ;;  %v522_v48 = vrot.slane %v2271_v57, 2 }
 0x2ea   :  { %v593_v4 = vpop.f32.mrf.mxu0  ;;  %v664_v52 = vpop.f32.mrf.mxu1 }
 0x2eb   :  { %v594_v56 = vadd.f32 %v593_v4, %v519_v59  ;;  %v665_v53 = vadd.f32 %v664_v52, %v521_v62 }
 0x2ec   :  { %v595_v63 = vpop.f32.mrf.mxu0  ;;  %v666_v1 = vpop.f32.mrf.mxu1 }
 0x2ed   :  { %v1675_v55 = vmul.f32 -1.442695, %v594_v56  ;;  %v1677_v46 = vmul.f32 -1.442695, %v665_v53  ;;  %v596_v0 = vadd.f32 %v595_v63, %v520_v44  ;;  %v667_v60 = vadd.f32 %v666_v1, %v522_v48 }
 0x2ef   :  { %1749 = vpow2.f32 %v1675_v55  ;;  %v1676_v49 = vmul.f32 -1.442695, %v596_v0  ;;  %v1678_v3 = vmul.f32 -1.442695, %v667_v60 }
 0x2f0   :  { %1751 = vpow2.f32 %v1677_v46 }
 0x2f1   :  { %1753 = vpow2.f32 %v1676_v49 }
 0x2fc   :  { %v1750_v58 = vpop.eup %1749 }
 0x2fd   :  { %v1752_v45 = vpop.eup %1751  ;;  %v681_v62 = vadd.f32 1.0, %v1750_v58 }
 0x2fe   :  { %v1754_v61 = vpop.eup %1753  ;;  %v683_v4 = vadd.f32 1.0, %v1752_v45 }
 0x2ff   :  { %v682_v59 = vadd.f32 1.0, %v1754_v61 }
 0x300   :  { %1755 = vrcp.f32 %v683_v4 }
 0x301   :  { %1757 = vpow2.f32 %v1678_v3  ;;  %v1606_v3 = vrot.slane %v2355_v50, 7 }
 0x302   :  { %1759 = vrcp.f32 %v682_v59 }
 0x303   :  { %1761 = vrcp.f32 %v681_v62 }
 0x30d   :  { %v1756_v63 = vpop.eup %1755 }
 0x30e   :  { %v1758_v55 = vpop.eup %1757  ;;  %v693_v56 = vmul.f32 2.0, %v1756_v63 }
 0x30f   :  { %v1760_v46 = vpop.eup %1759  ;;  %v684_v0 = vadd.f32 1.0, %v1758_v55 }
 0x310   :  { %v1679_v44 = vadd.f32 -1.0, %v693_v56  ;;  %v1762_v49 = vpop.eup %1761  ;;  %v695_v53 = vmul.f32 %v1760_v46, %v2352_v2  ;;  %v3074_v2 = vld [vmem:[#allocation33_spill] sm:$0xff] }
 0x311   :  { %1763 = vrcp.f32 %v684_v0  ;;  %v1627_v48 = vsel %vm1626_vm0, %v3074_v2, %v1606_v3 }
 0x312   :  { %v696_v52 = vmul.f32 %v1762_v49, %v1679_v44 }
 0x314   :  { %v2430_v1 = vadd.f32 %v696_v52, %v695_v53 }
 0x316   :  { %1765 = vtanh.f32 %v2430_v1 }
 0x31e   :  { %v1764_v61 = vpop.eup %1763 }
 0x323   :  { %v1766_v58 = vpop.eup %1765 }
 0x324   :  { %v699_v45 = vmul.f32 %v1766_v58, %v1764_v61 }
 0x326   :  { %773 = vmatmul.mubr.f32.vlgmr.msra.gmra.mxu0 %v699_v45  ;;  %v1609_v60 = vrot.slane %v699_v45, 6  ;;  %844 = vmatmul.mubr.f32.vlgmr.msra.gmra.mxu1 %v699_v45 }
 0x327   :  { %890 = vmatpush1.msra.mxu0 %v1995_v5  ;;  %961 = vmatpush1.msra.mxu1 %v1999_v6  ;;  %v3075_v5 = vld [vmem:[#allocation10_spill] sm:$0xff]  ;;  %v3076_v6 = vld [vmem:[#allocation11_spill] sm:$0xff] }
 0x328   :  { %891 = vmatprep.subr.mxu0 %v2001_v7  ;;  %962 = vmatprep.subr.mxu1 %v2003_v8  ;;  %v2439_v4 = vsel %vm1628_vm1, %v1627_v48, %v1609_v60  ;;  %v3077_v7 = vld [vmem:[#allocation12_spill] sm:$0xff]  ;;  %v3078_v8 = vld [vmem:[#allocation13_spill] sm:$0xff] }
 0x329   :  { %892 = vmatpush1.msra.mxu0 %v2007_v9  ;;  %963 = vmatpush1.msra.mxu1 %v2009_v10  ;;  %v3079_v9 = vld [vmem:[#allocation14_spill] sm:$0xff]  ;;  %v3080_v10 = vld [vmem:[#allocation15_spill] sm:$0xff] }
 0x32a   :  { %893 = vmatprep.subr.mxu0 %v2011_v11  ;;  %964 = vmatprep.subr.mxu1 %v2015_v12  ;;  %v3081_v11 = vld [vmem:[#allocation16_spill] sm:$0xff]  ;;  %v3082_v12 = vld [vmem:[#allocation17_spill] sm:$0xff] }
 0x32b   :  { %894 = vmatpush1.msra.mxu0 %v2017_v13  ;;  %965 = vmatpush1.msra.mxu1 %v2019_v14  ;;  %v3083_v13 = vld [vmem:[#allocation18_spill] sm:$0xff]  ;;  %v3084_v14 = vld [vmem:[#allocation19_spill] sm:$0xff] }
 0x32c   :  { %895 = vmatprep.subr.mxu0 %v2023_v15  ;;  %966 = vmatprep.subr.mxu1 %v2025_v16  ;;  %v3085_v15 = vld [vmem:[#allocation20_spill] sm:$0xff]  ;;  %v3086_v16 = vld [vmem:[#allocation21_spill] sm:$0xff] }
 0x32d   :  { %896 = vmatpush1.msra.mxu0 %v2029_v17  ;;  %967 = vmatpush1.msra.mxu1 %v2031_v18  ;;  %v3087_v17 = vld [vmem:[#allocation22_spill] sm:$0xff]  ;;  %v3088_v18 = vld [vmem:[#allocation23_spill] sm:$0xff] }
 0x32e   :  { %897 = vmatprep.subr.mxu0 %v2035_v19  ;;  %968 = vmatprep.subr.mxu1 %v2037_v20  ;;  %v3089_v19 = vld [vmem:[#allocation24_spill] sm:$0xff]  ;;  %v3090_v20 = vld [vmem:[#allocation25_spill] sm:$0xff] }
 0x32f   :  { %898 = vmatpush1.msra.mxu0 %v2041_v21  ;;  %969 = vmatpush1.msra.mxu1 %v2043_v22  ;;  %v3091_v21 = vld [vmem:[#allocation26_spill] sm:$0xff]  ;;  %v3092_v22 = vld [vmem:[#allocation27_spill] sm:$0xff] }
 0x330   :  { %899 = vmatprep.subr.mxu0 %v2047_v23  ;;  %970 = vmatprep.subr.mxu1 %v2049_v24  ;;  %v3093_v23 = vld [vmem:[#allocation28_spill] sm:$0xff]  ;;  %v3094_v24 = vld [vmem:[#allocation29_spill] sm:$0xff] }
 0x331   :  { %900 = vmatpush1.msra.mxu0 %v2053_v25  ;;  %971 = vmatpush1.msra.mxu1 %v2055_v26  ;;  %v3095_v25 = vmov 0.0   ;;  %v3096_v26 = vld [vmem:[#allocation30_spill] sm:$0xff] }
 0x332   :  { %901 = vmatprep.subr.mxu0 %v2059_v27  ;;  %972 = vmatprep.subr.mxu1 %v2061_v28  ;;  %v2501_v27 = vld [vmem:[#allocation3 + $0x1e8] sm:$0xff]  ;;  %v2504_v28 = vld [vmem:[#allocation3 + $0x1f8] sm:$0xff] }
 0x333   :  { %902 = vmatpush1.msra.mxu0 %v2065_v29  ;;  %973 = vmatpush1.msra.mxu1 %v2067_v30  ;;  %3097 = vst [vmem:[#allocation8_spill] sm:$0xff] %v2501_v27  ;;  %3098 = vst [vmem:[#allocation9_spill] sm:$0xff] %v2504_v28  ;;  %v3099_v29 = vld [vmem:[#allocation31_spill] sm:$0xff] }
 0x334   :  { %903 = vmatprep.subr.mxu0 %v2071_v31  ;;  %974 = vmatprep.subr.mxu1 %v2073_v32  ;;  %v700_v30 = vrot.slane %v3099_v29, 3  ;;  %v3100_v31 = vld [vmem:[#allocation32_spill] sm:$0xff] }
 0x335   :  { %904 = vmatpush1.msra.mxu0 %v2077_v33  ;;  %975 = vmatpush1.msra.mxu1 %v2079_v34  ;;  %v702_v32 = vrot.slane %v3100_v31, 3 }
 0x336   :  { %905 = vmatprep.subr.mxu0 %v2083_v35  ;;  %976 = vmatprep.subr.mxu1 %v2085_v36 }
 0x337   :  { %906 = vmatpush1.msra.mxu0 %v2089_v37  ;;  %977 = vmatpush1.msra.mxu1 %v2091_v38  ;;  %v701_v37 = vrot.slane %v2266_v47, 3 }
 0x338   :  { %907 = vmatprep.subr.mxu0 %v2095_v39  ;;  %978 = vmatprep.subr.mxu1 %v2097_v40 }
 0x339   :  { %908 = vmatpush1.msra.mxu0 %v2101_v41  ;;  %979 = vmatpush1.msra.mxu1 %v2103_v42 }
 0x33a   :  { %909 = vmatprep.subr.mxu0 %v2107_v43  ;;  %980 = vmatprep.subr.mxu1 %v3023_v54  ;;  %v703_v54 = vrot.slane %v2271_v57, 3 }
 0x33b   :  { %910 = vmatpush1.msra.mxu0 %v3024_v51  ;;  %981 = vmatpush1.msra.mxu1 %v3075_v5 }
 0x33c   :  { %911 = vmatprep.subr.mxu0 %v3076_v6  ;;  %982 = vmatprep.subr.mxu1 %v3077_v7  ;;  %v2515_v7 = vld [vmem:[#allocation3 + $0x1e0] sm:$0xff] }
 0x33d   :  { %912 = vmatpush1.msra.mxu0 %v3078_v8  ;;  %983 = vmatpush1.msra.mxu1 %v3079_v9  ;;  %v2518_v8 = vld [vmem:[#allocation3 + $0x1f0] sm:$0xff]  ;;  %v2524_v9 = vld [vmem:[#allocation3 + $0x1d8] sm:$0xff] }
 0x33e   :  { %913 = vmatprep.subr.mxu0 %v3080_v10  ;;  %984 = vmatprep.subr.mxu1 %v3081_v11  ;;  %v2530_v11 = vld [vmem:[#allocation3 + $0x1c0] sm:$0xff] }
 0x33f   :  { %914 = vmatpush1.msra.mxu0 %v3082_v12  ;;  %985 = vmatpush1.msra.mxu1 %v3083_v13  ;;  %v2533_v12 = vld [vmem:[#allocation3 + $0x1d0] sm:$0xff]  ;;  %v2536_v13 = vld [vmem:[#allocation3 + $0x1a8] sm:$0xff] }
 0x340   :  { %915 = vmatprep.subr.mxu0 %v3084_v14  ;;  %986 = vmatprep.subr.mxu1 %v3085_v15  ;;  %v2539_v14 = vld [vmem:[#allocation3 + $0x1b8] sm:$0xff]  ;;  %v2542_v15 = vld [vmem:[#allocation3 + $0x1a0] sm:$0xff] }
 0x341   :  { %916 = vmatpush1.msra.mxu0 %v3086_v16  ;;  %987 = vmatpush1.msra.mxu1 %v3087_v17  ;;  %v2548_v16 = vld [vmem:[#allocation3 + $0x188] sm:$0xff]  ;;  %v2551_v17 = vld [vmem:[#allocation3 + $0x198] sm:$0xff] }
 0x342   :  { %917 = vmatprep.subr.mxu0 %v3088_v18  ;;  %988 = vmatprep.subr.mxu1 %v3089_v19  ;;  %v2554_v18 = vld [vmem:[#allocation3 + $0x180] sm:$0xff]  ;;  %v2557_v19 = vld [vmem:[#allocation3 + $0x190] sm:$0xff] }
 0x343   :  { %918 = vmatpush1.msra.mxu0 %v3090_v20  ;;  %989 = vmatpush1.msra.mxu1 %v3091_v21  ;;  %v2560_v20 = vld [vmem:[#allocation3 + $0x168] sm:$0xff]  ;;  %v2563_v21 = vld [vmem:[#allocation3 + $0x178] sm:$0xff] }
 0x344   :  { %919 = vmatprep.subr.mxu0 %v3092_v22  ;;  %990 = vmatprep.subr.mxu1 %v3093_v23  ;;  %v2566_v22 = vld [vmem:[#allocation3 + $0x160] sm:$0xff]  ;;  %v2569_v23 = vld [vmem:[#allocation3 + $0x170] sm:$0xff] }
 0x345   :  { %920 = vmatpush1.msra.mxu0 %v3094_v24  ;;  %953 = vmatprep.mubr.f32.mxu0 %v3095_v25  ;;  %v2572_v24 = vld [vmem:[#allocation3 + $0x148] sm:$0xff] }
 0x346   :  { %991 = vmatpush1.msra.mxu1 %v3096_v26  ;;  %1024 = vmatprep.mubr.f32.mxu1 %v3095_v25  ;;  %v2575_v26 = vld [vmem:[#allocation3 + $0x158] sm:$0xff] }
 0x347   :  { %1070 = vmatprep.subr.mxu0 %v2501_v27  ;;  %1141 = vmatprep.subr.mxu1 %v2504_v28 }
 0x3e6   :  { %v774_v33 = vpop.f32.mrf.mxu0  ;;  %v845_v34 = vpop.f32.mrf.mxu1 }
 0x3e7   :  { %v775_v35 = vadd.f32 %v774_v33, %v700_v30  ;;  %v846_v36 = vadd.f32 %v845_v34, %v702_v32  ;;  %v2578_v30 = vld [vmem:[#allocation3 + $0x140] sm:$0xff]  ;;  %v2581_v32 = vld [vmem:[#allocation3 + $0x150] sm:$0xff]  ;;  %v2584_v33 = vld [vmem:[#allocation3 + $0x128] sm:$0xff] }
 0x3e8   :  { %v776_v38 = vpop.f32.mrf.mxu0  ;;  %v847_v43 = vpop.f32.mrf.mxu1  ;;  %v2587_v34 = vld [vmem:[#allocation3 + $0x138] sm:$0xff] }
 0x3e9   :  { %v1680_v39 = vmul.f32 -1.442695, %v775_v35  ;;  %v1682_v40 = vmul.f32 -1.442695, %v846_v36  ;;  %v777_v41 = vadd.f32 %v776_v38, %v701_v37  ;;  %v848_v51 = vadd.f32 %v847_v43, %v703_v54  ;;  %v2590_v35 = vld [vmem:[#allocation3 + $0x120] sm:$0xff]  ;;  %v2593_v36 = vld [vmem:[#allocation3 + $0x130] sm:$0xff] }
 0x3ea   :  { %v2596_v37 = vld [vmem:[#allocation3 + $0x108] sm:$0xff]  ;;  %v2599_v38 = vld [vmem:[#allocation3 + $0x118] sm:$0xff]  ;;  %v2614_v43 = vld [vmem:[#allocation3 + $0xe0] sm:$0xff] }
 0x3eb   :  { %1767 = vpow2.f32 %v1680_v39  ;;  %v1681_v42 = vmul.f32 -1.442695, %v777_v41  ;;  %v1683_v62 = vmul.f32 -1.442695, %v848_v51  ;;  %v2602_v39 = vld [vmem:[#allocation3 + $0x100] sm:$0xff]  ;;  %v2608_v41 = vld [vmem:[#allocation3 + $0xe8] sm:$0xff] }
 0x3ec   :  { %1769 = vpow2.f32 %v1682_v40  ;;  %v2605_v40 = vld [vmem:[#allocation3 + $0x110] sm:$0xff]  ;;  %v2620_v51 = vld [vmem:[#allocation3 + $0xc8] sm:$0xff] }
 0x3ed   :  { %1771 = vpow2.f32 %v1681_v42  ;;  %v2611_v42 = vld [vmem:[#allocation3 + $0xf8] sm:$0xff]  ;;  %v2617_v54 = vld [vmem:[#allocation3 + $0xf0] sm:$0xff] }
 0x3f8   :  { %v1768_v50 = vpop.eup %1767 }
 0x3f9   :  { %v1770_v59 = vpop.eup %1769  ;;  %v862_v46 = vadd.f32 1.0, %v1768_v50  ;;  %v2623_v50 = vld [vmem:[#allocation3 + $0xd8] sm:$0xff] }
 0x3fa   :  { %v1772_v63 = vpop.eup %1771  ;;  %v864_v55 = vadd.f32 1.0, %v1770_v59  ;;  %v2626_v59 = vld [vmem:[#allocation3 + $0xc0] sm:$0xff] }
 0x3fb   :  { %v863_v56 = vadd.f32 1.0, %v1772_v63  ;;  %v2632_v63 = vld [vmem:[#allocation3 + $0xa8] sm:$0xff] }
 0x3fc   :  { %1773 = vrcp.f32 %v864_v55  ;;  %v2635_v55 = vld [vmem:[#allocation3 + $0xb8] sm:$0xff] }
 0x3fd   :  { %1775 = vpow2.f32 %v1683_v62  ;;  %v2629_v62 = vld [vmem:[#allocation3 + $0xd0] sm:$0xff] }
 0x3fe   :  { %1777 = vrcp.f32 %v863_v56  ;;  %v2638_v56 = vld [vmem:[#allocation3 + $0xa0] sm:$0xff] }
 0x3ff   :  { %1779 = vrcp.f32 %v862_v46  ;;  %v2641_v46 = vld [vmem:[#allocation3 + $0xb0] sm:$0xff] }
 0x400   :  { %3101 = vst [vmem:[#allocation6_spill] sm:$0xff] %v2641_v46 }
 0x409   :  { %v1774_v44 = vpop.eup %1773 }
 0x40a   :  { %v1776_v49 = vpop.eup %1775  ;;  %v874_v0 = vmul.f32 2.0, %v1774_v44  ;;  %v2644_v44 = vld [vmem:[#allocation3 + $0x88] sm:$0xff] }
 0x40b   :  { %v1778_v52 = vpop.eup %1777  ;;  %v865_v58 = vadd.f32 1.0, %v1776_v49  ;;  %3102 = vst [vmem:[#allocation7_spill] sm:$0xff] %v2644_v44  ;;  %v2647_v49 = vld [vmem:[#allocation3 + $0x98] sm:$0xff] }
 0x40c   :  { %v1684_v53 = vadd.f32 -1.0, %v874_v0  ;;  %v1780_v61 = vpop.eup %1779  ;;  %v876_v45 = vmul.f32 %v1778_v52, %v2430_v1  ;;  %v2521_v1 = vld [vmem:[#allocation3 + $0x1c8] sm:$0xff]  ;;  %3103 = vst [vmem:[#allocation33_spill] sm:$0xff] %v2647_v49  ;;  %v2650_v0 = vld [vmem:[#allocation3 + $0x80] sm:$0xff]  ;;  %v2653_v52 = vld [vmem:[#allocation3 + $0x90] sm:$0xff] }
 0x40d   :  { %1781 = vrcp.f32 %v865_v58  ;;  %3104 = vst [vmem:[#allocation10_spill] sm:$0xff] %v2650_v0  ;;  %3105 = vst [vmem:[#allocation11_spill] sm:$0xff] %v2653_v52  ;;  %v2662_v58 = vld [vmem:[#allocation3 + $0x60] sm:$0xff] }
 0x40e   :  { %v877_v3 = vmul.f32 %v1780_v61, %v1684_v53  ;;  %v2656_v53 = vld [vmem:[#allocation3 + $0x68] sm:$0xff]  ;;  %v2659_v61 = vld [vmem:[#allocation3 + $0x78] sm:$0xff]  ;;  %3108 = vst [vmem:[#allocation14_spill] sm:$0xff] %v2662_v58 }
 0x40f   :  { %3106 = vst [vmem:[#allocation12_spill] sm:$0xff] %v2656_v53  ;;  %3107 = vst [vmem:[#allocation13_spill] sm:$0xff] %v2659_v61 }
 0x410   :  { %v2512_v60 = vadd.f32 %v877_v3, %v876_v45  ;;  %v2665_v3 = vld [vmem:[#allocation3 + $0x70] sm:$0xff]  ;;  %v2668_v45 = vld [vmem:[#allocation3 + $0x48] sm:$0xff] }
 0x411   :  { %3109 = vst [vmem:[#allocation15_spill] sm:$0xff] %v2665_v3  ;;  %3110 = vst [vmem:[#allocation16_spill] sm:$0xff] %v2668_v45 }
 0x412   :  { %1783 = vtanh.f32 %v2512_v60 }
 0x41a   :  { %v1782_v2 = vpop.eup %1781 }
 0x41f   :  { %v1784_v48 = vpop.eup %1783 }
 0x420   :  { %v880_v5 = vmul.f32 %v1784_v48, %v1782_v2  ;;  %v2671_v2 = vld [vmem:[#allocation3 + $0x58] sm:$0xff]  ;;  %v2674_v48 = vld [vmem:[#allocation3 + $0x40] sm:$0xff] }
 0x421   :  { %3111 = vst [vmem:[#allocation17_spill] sm:$0xff] %v2671_v2  ;;  %3112 = vst [vmem:[#allocation18_spill] sm:$0xff] %v2674_v48 }
 0x422   :  { %954 = vmatmul.mubr.f32.vlgmr.msra.gmra.mxu0 %v880_v5  ;;  %v1612_v6 = vrot.slane %v880_v5, 5  ;;  %1025 = vmatmul.mubr.f32.vlgmr.msra.gmra.mxu1 %v880_v5  ;;  %v2677_v5 = vld [vmem:[#allocation3 + $0x50] sm:$0xff] }
 0x423   :  { %1071 = vmatpush1.msra.mxu0 %v2515_v7  ;;  %1142 = vmatpush1.msra.mxu1 %v2518_v8  ;;  %3113 = vst [vmem:[#allocation19_spill] sm:$0xff] %v2677_v5 }
 0x424   :  { %1072 = vmatprep.subr.mxu0 %v2521_v1  ;;  %1143 = vmatprep.subr.mxu1 %v2524_v9  ;;  %v2528_v10 = vsel %vm1630_vm2, %v2439_v4, %v1612_v6  ;;  %v2545_v4 = vld [vmem:[#allocation3 + $0x1b0] sm:$0xff]  ;;  %v2680_v6 = vld [vmem:[#allocation3 + $0x28] sm:$0xff] }
 0x425   :  { %1073 = vmatpush1.msra.mxu0 %v2530_v11  ;;  %1144 = vmatpush1.msra.mxu1 %v2533_v12  ;;  %3114 = vst [vmem:[#allocation20_spill] sm:$0xff] %v2680_v6 }
 0x426   :  { %1074 = vmatprep.subr.mxu0 %v2536_v13  ;;  %1145 = vmatprep.subr.mxu1 %v2539_v14 }
 0x427   :  { %1075 = vmatpush1.msra.mxu0 %v2542_v15  ;;  %1146 = vmatpush1.msra.mxu1 %v2545_v4 }
 0x428   :  { %1076 = vmatprep.subr.mxu0 %v2548_v16  ;;  %1147 = vmatprep.subr.mxu1 %v2551_v17 }
 0x429   :  { %1077 = vmatpush1.msra.mxu0 %v2554_v18  ;;  %1148 = vmatpush1.msra.mxu1 %v2557_v19 }
 0x42a   :  { %1078 = vmatprep.subr.mxu0 %v2560_v20  ;;  %1149 = vmatprep.subr.mxu1 %v2563_v21 }
 0x42b   :  { %1079 = vmatpush1.msra.mxu0 %v2566_v22  ;;  %1150 = vmatpush1.msra.mxu1 %v2569_v23 }
 0x42c   :  { %1080 = vmatprep.subr.mxu0 %v2572_v24  ;;  %1151 = vmatprep.subr.mxu1 %v2575_v26 }
 0x42d   :  { %1081 = vmatpush1.msra.mxu0 %v2578_v30  ;;  %1152 = vmatpush1.msra.mxu1 %v2581_v32 }
 0x42e   :  { %1082 = vmatprep.subr.mxu0 %v2584_v33  ;;  %1153 = vmatprep.subr.mxu1 %v2587_v34 }
 0x42f   :  { %1083 = vmatpush1.msra.mxu0 %v2590_v35  ;;  %1154 = vmatpush1.msra.mxu1 %v2593_v36 }
 0x430   :  { %1084 = vmatprep.subr.mxu0 %v2596_v37  ;;  %1155 = vmatprep.subr.mxu1 %v2599_v38 }
 0x431   :  { %1085 = vmatpush1.msra.mxu0 %v2602_v39  ;;  %1156 = vmatpush1.msra.mxu1 %v2605_v40 }
 0x432   :  { %1086 = vmatprep.subr.mxu0 %v2608_v41  ;;  %1157 = vmatprep.subr.mxu1 %v2611_v42 }
 0x433   :  { %1087 = vmatpush1.msra.mxu0 %v2614_v43  ;;  %1158 = vmatpush1.msra.mxu1 %v2617_v54 }
 0x434   :  { %1088 = vmatprep.subr.mxu0 %v2620_v51  ;;  %1159 = vmatprep.subr.mxu1 %v2623_v50 }
 0x435   :  { %1089 = vmatpush1.msra.mxu0 %v2626_v59  ;;  %1160 = vmatpush1.msra.mxu1 %v2629_v62 }
 0x436   :  { %1090 = vmatprep.subr.mxu0 %v2632_v63  ;;  %1161 = vmatprep.subr.mxu1 %v2635_v55 }
 0x437   :  { %1091 = vmatpush1.msra.mxu0 %v2638_v56  ;;  %1162 = vmatpush1.msra.mxu1 %v2641_v46 }
 0x438   :  { %1092 = vmatprep.subr.mxu0 %v2644_v44  ;;  %1163 = vmatprep.subr.mxu1 %v2647_v49 }
 0x439   :  { %1093 = vmatpush1.msra.mxu0 %v2650_v0  ;;  %1164 = vmatpush1.msra.mxu1 %v2653_v52 }
 0x43a   :  { %1094 = vmatprep.subr.mxu0 %v2656_v53  ;;  %1165 = vmatprep.subr.mxu1 %v2659_v61  ;;  %v882_v61 = vrot.slane %v2266_v47, 4 }
 0x43b   :  { %1095 = vmatpush1.msra.mxu0 %v2662_v58  ;;  %1166 = vmatpush1.msra.mxu1 %v2665_v3  ;;  %v2683_v3 = vld [vmem:[#allocation3 + $0x38] sm:$0xff] }
 0x43c   :  { %1096 = vmatprep.subr.mxu0 %v2668_v45  ;;  %1167 = vmatprep.subr.mxu1 %v2671_v2  ;;  %3115 = vst [vmem:[#allocation21_spill] sm:$0xff] %v2683_v3  ;;  %v2686_v45 = vld [vmem:[#allocation3 + $0x20] sm:$0xff]  ;;  %v2689_v2 = vld [vmem:[#allocation3 + $0x30] sm:$0xff] }
 0x43d   :  { %1097 = vmatpush1.msra.mxu0 %v2674_v48  ;;  %1168 = vmatpush1.msra.mxu1 %v2677_v5  ;;  %3116 = vst [vmem:[#allocation22_spill] sm:$0xff] %v2686_v45  ;;  %3117 = vst [vmem:[#allocation23_spill] sm:$0xff] %v2689_v2  ;;  %v2692_v48 = vld [vmem:[#allocation3 + $0x8] sm:$0xff]  ;;  %v2695_v5 = vld [vmem:[#allocation3 + $0x18] sm:$0xff] }
 0x43e   :  { %1098 = vmatprep.subr.mxu0 %v2680_v6  ;;  %1169 = vmatprep.subr.mxu1 %v2683_v3  ;;  %3118 = vst [vmem:[#allocation24_spill] sm:$0xff] %v2692_v48  ;;  %3119 = vst [vmem:[#allocation25_spill] sm:$0xff] %v2695_v5  ;;  %v2698_v6 = vld [vmem:[#allocation3] sm:$0xff]  ;;  %v2702_v3 = vld [vmem:[#allocation3 + $0x10] sm:$0xff] }
 0x43f   :  { %1099 = vmatpush1.msra.mxu0 %v2686_v45  ;;  %1170 = vmatpush1.msra.mxu1 %v2689_v2  ;;  %3120 = vst [vmem:[#allocation26_spill] sm:$0xff] %v2698_v6  ;;  %3121 = vst [vmem:[#allocation27_spill] sm:$0xff] %v2702_v3 }
 0x440   :  { %1100 = vmatprep.subr.mxu0 %v2692_v48  ;;  %1171 = vmatprep.subr.mxu1 %v2695_v5  ;;  %v881_v48 = vrot.slane %v3099_v29, 4  ;;  %v883_v5 = vrot.slane %v3100_v31, 4 }
 0x441   :  { %1101 = vmatpush1.msra.mxu0 %v2698_v6  ;;  %1134 = vmatprep.mubr.f32.mxu0 %v3095_v25 }
 0x442   :  { %1172 = vmatpush1.msra.mxu1 %v2702_v3  ;;  %1205 = vmatprep.mubr.f32.mxu1 %v3095_v25 }
 0x443   :  { %1251 = vmatprep.subr.mxu0 %v2501_v27  ;;  %1322 = vmatprep.subr.mxu1 %v2504_v28  ;;  %v884_v28 = vrot.slane %v2271_v57, 4 }
 0x4e2   :  { %v955_v2 = vpop.f32.mrf.mxu0  ;;  %v1026_v45 = vpop.f32.mrf.mxu1 }
 0x4e3   :  { %v956_v58 = vadd.f32 %v955_v2, %v881_v48  ;;  %v1027_v6 = vadd.f32 %v1026_v45, %v883_v5 }
 0x4e4   :  { %v957_v53 = vpop.f32.mrf.mxu0  ;;  %v1028_v27 = vpop.f32.mrf.mxu1 }
 0x4e5   :  { %v1685_v52 = vmul.f32 -1.442695, %v956_v58  ;;  %v1687_v0 = vmul.f32 -1.442695, %v1027_v6  ;;  %v958_v3 = vadd.f32 %v957_v53, %v882_v61  ;;  %v1029_v29 = vadd.f32 %v1028_v27, %v884_v28  ;;  %v3124_v6 = vld [vmem:[#allocation33_spill] sm:$0xff] }
 0x4e7   :  { %1785 = vpow2.f32 %v1685_v52  ;;  %v1686_v25 = vmul.f32 -1.442695, %v958_v3  ;;  %v1688_v44 = vmul.f32 -1.442695, %v1029_v29 }
 0x4e8   :  { %1787 = vpow2.f32 %v1687_v0 }
 0x4e9   :  { %1789 = vpow2.f32 %v1686_v25 }
 0x4f4   :  { %v1786_v49 = vpop.eup %1785 }
 0x4f5   :  { %v1788_v31 = vpop.eup %1787  ;;  %v1043_v48 = vadd.f32 1.0, %v1786_v49  ;;  %v3123_v49 = vld [vmem:[#allocation7_spill] sm:$0xff] }
 0x4f6   :  { %v1790_v46 = vpop.eup %1789  ;;  %v1045_v2 = vadd.f32 1.0, %v1788_v31 }
 0x4f7   :  { %v1044_v45 = vadd.f32 1.0, %v1790_v46 }
 0x4f8   :  { %1791 = vrcp.f32 %v1045_v2  ;;  %v3125_v2 = vld [vmem:[#allocation10_spill] sm:$0xff] }
 0x4f9   :  { %1793 = vpow2.f32 %v1688_v44 }
 0x4fa   :  { %1795 = vrcp.f32 %v1044_v45  ;;  %v3126_v45 = vld [vmem:[#allocation11_spill] sm:$0xff] }
 0x4fb   :  { %1797 = vrcp.f32 %v1043_v48  ;;  %v3127_v48 = vld [vmem:[#allocation12_spill] sm:$0xff] }
 0x505   :  { %v1792_v53 = vpop.eup %1791 }
 0x506   :  { %v1794_v52 = vpop.eup %1793  ;;  %v1055_v61 = vmul.f32 2.0, %v1792_v53  ;;  %v3128_v53 = vld [vmem:[#allocation13_spill] sm:$0xff] }
 0x507   :  { %v1796_v0 = vpop.eup %1795  ;;  %v1046_v3 = vadd.f32 1.0, %v1794_v52  ;;  %v3129_v52 = vld [vmem:[#allocation14_spill] sm:$0xff] }
 0x508   :  { %v1689_v25 = vadd.f32 -1.0, %v1055_v61  ;;  %v1798_v58 = vpop.eup %1797  ;;  %v1057_v27 = vmul.f32 %v1796_v0, %v2512_v60  ;;  %v3130_v61 = vld [vmem:[#allocation15_spill] sm:$0xff]  ;;  %v3131_v0 = vld [vmem:[#allocation16_spill] sm:$0xff] }
 0x509   :  { %1799 = vrcp.f32 %v1046_v3  ;;  %v3134_v3 = vld [vmem:[#allocation19_spill] sm:$0xff] }
 0x50a   :  { %v1058_v5 = vmul.f32 %v1798_v58, %v1689_v25  ;;  %v3132_v25 = vld [vmem:[#allocation17_spill] sm:$0xff]  ;;  %v3133_v58 = vld [vmem:[#allocation18_spill] sm:$0xff] }
 0x50c   :  { %v2713_v28 = vadd.f32 %v1058_v5, %v1057_v27  ;;  %v3135_v5 = vld [vmem:[#allocation20_spill] sm:$0xff]  ;;  %v3136_v27 = vld [vmem:[#allocation21_spill] sm:$0xff] }
 0x50e   :  { %1801 = vtanh.f32 %v2713_v28 }
 0x516   :  { %v1800_v29 = vpop.eup %1799 }
 0x51b   :  { %v1802_v31 = vpop.eup %1801 }
 0x51c   :  { %v1061_v46 = vmul.f32 %v1802_v31, %v1800_v29  ;;  %v3137_v29 = vld [vmem:[#allocation22_spill] sm:$0xff]  ;;  %v3138_v31 = vld [vmem:[#allocation23_spill] sm:$0xff] }
 0x51e   :  { %1135 = vmatmul.mubr.f32.vlgmr.msra.gmra.mxu0 %v1061_v46  ;;  %v1615_v44 = vrot.slane %v1061_v46, 4  ;;  %1206 = vmatmul.mubr.f32.vlgmr.msra.gmra.mxu1 %v1061_v46  ;;  %v3139_v46 = vld [vmem:[#allocation24_spill] sm:$0xff] }
 0x51f   :  { %1252 = vmatpush1.msra.mxu0 %v2515_v7  ;;  %1323 = vmatpush1.msra.mxu1 %v2518_v8 }
 0x520   :  { %1253 = vmatprep.subr.mxu0 %v2521_v1  ;;  %1324 = vmatprep.subr.mxu1 %v2524_v9  ;;  %v2721_v60 = vsel %vm1632_vm3, %v2528_v10, %v1615_v44  ;;  %v3122_v10 = vld [vmem:[#allocation6_spill] sm:$0xff]  ;;  %v3140_v44 = vld [vmem:[#allocation25_spill] sm:$0xff] }
 0x521   :  { %1254 = vmatpush1.msra.mxu0 %v2530_v11  ;;  %1325 = vmatpush1.msra.mxu1 %v2533_v12 }
 0x522   :  { %1255 = vmatprep.subr.mxu0 %v2536_v13  ;;  %1326 = vmatprep.subr.mxu1 %v2539_v14 }
 0x523   :  { %1256 = vmatpush1.msra.mxu0 %v2542_v15  ;;  %1327 = vmatpush1.msra.mxu1 %v2545_v4 }
 0x524   :  { %1257 = vmatprep.subr.mxu0 %v2548_v16  ;;  %1328 = vmatprep.subr.mxu1 %v2551_v17 }
 0x525   :  { %1258 = vmatpush1.msra.mxu0 %v2554_v18  ;;  %1329 = vmatpush1.msra.mxu1 %v2557_v19 }
 0x526   :  { %1259 = vmatprep.subr.mxu0 %v2560_v20  ;;  %1330 = vmatprep.subr.mxu1 %v2563_v21 }
 0x527   :  { %1260 = vmatpush1.msra.mxu0 %v2566_v22  ;;  %1331 = vmatpush1.msra.mxu1 %v2569_v23 }
 0x528   :  { %1261 = vmatprep.subr.mxu0 %v2572_v24  ;;  %1332 = vmatprep.subr.mxu1 %v2575_v26 }
 0x529   :  { %1262 = vmatpush1.msra.mxu0 %v2578_v30  ;;  %1333 = vmatpush1.msra.mxu1 %v2581_v32 }
 0x52a   :  { %1263 = vmatprep.subr.mxu0 %v2584_v33  ;;  %1334 = vmatprep.subr.mxu1 %v2587_v34 }
 0x52b   :  { %1264 = vmatpush1.msra.mxu0 %v2590_v35  ;;  %1335 = vmatpush1.msra.mxu1 %v2593_v36 }
 0x52c   :  { %1265 = vmatprep.subr.mxu0 %v2596_v37  ;;  %1336 = vmatprep.subr.mxu1 %v2599_v38 }
 0x52d   :  { %1266 = vmatpush1.msra.mxu0 %v2602_v39  ;;  %1337 = vmatpush1.msra.mxu1 %v2605_v40 }
 0x52e   :  { %1267 = vmatprep.subr.mxu0 %v2608_v41  ;;  %1338 = vmatprep.subr.mxu1 %v2611_v42 }
 0x52f   :  { %1268 = vmatpush1.msra.mxu0 %v2614_v43  ;;  %1339 = vmatpush1.msra.mxu1 %v2617_v54 }
 0x530   :  { %1269 = vmatprep.subr.mxu0 %v2620_v51  ;;  %1340 = vmatprep.subr.mxu1 %v2623_v50 }
 0x531   :  { %1270 = vmatpush1.msra.mxu0 %v2626_v59  ;;  %1341 = vmatpush1.msra.mxu1 %v2629_v62 }
 0x532   :  { %1271 = vmatprep.subr.mxu0 %v2632_v63  ;;  %1342 = vmatprep.subr.mxu1 %v2635_v55 }
 0x533   :  { %1272 = vmatpush1.msra.mxu0 %v2638_v56  ;;  %1343 = vmatpush1.msra.mxu1 %v3122_v10 }
 0x534   :  { %1273 = vmatprep.subr.mxu0 %v3123_v49  ;;  %1344 = vmatprep.subr.mxu1 %v3124_v6 }
 0x535   :  { %1274 = vmatpush1.msra.mxu0 %v3125_v2  ;;  %1345 = vmatpush1.msra.mxu1 %v3126_v45 }
 0x536   :  { %1275 = vmatprep.subr.mxu0 %v3127_v48  ;;  %1346 = vmatprep.subr.mxu1 %v3128_v53 }
 0x537   :  { %1276 = vmatpush1.msra.mxu0 %v3129_v52  ;;  %1347 = vmatpush1.msra.mxu1 %v3130_v61  ;;  %v3141_v61 = vld [vmem:[#allocation26_spill] sm:$0xff] }
 0x538   :  { %1277 = vmatprep.subr.mxu0 %v3131_v0  ;;  %1348 = vmatprep.subr.mxu1 %v3132_v25  ;;  %v3142_v0 = vmov 0.0   ;;  %v3143_v25 = vld [vmem:[#allocation27_spill] sm:$0xff] }
 0x539   :  { %1278 = vmatpush1.msra.mxu0 %v3133_v58  ;;  %1349 = vmatpush1.msra.mxu1 %v3134_v3  ;;  %v3144_v3 = vld [vmem:[#allocation8_spill] sm:$0xff] }
 0x53a   :  { %1279 = vmatprep.subr.mxu0 %v3135_v5  ;;  %1350 = vmatprep.subr.mxu1 %v3136_v27  ;;  %v3145_v5 = vld [vmem:[#allocation9_spill] sm:$0xff]  ;;  %v3146_v27 = vld [vmem:[#allocation31_spill] sm:$0xff]  ;;  %v3147_v58 = vld [vmem:[#allocation32_spill] sm:$0xff] }
 0x53b   :  { %1280 = vmatpush1.msra.mxu0 %v3137_v29  ;;  %1351 = vmatpush1.msra.mxu1 %v3138_v31  ;;  %v1062_v29 = vrot.slane %v3146_v27, 5  ;;  %v1064_v31 = vrot.slane %v3147_v58, 5 }
 0x53c   :  { %1281 = vmatprep.subr.mxu0 %v3139_v46  ;;  %1352 = vmatprep.subr.mxu1 %v3140_v44 }
 0x53d   :  { %1282 = vmatpush1.msra.mxu0 %v3141_v61  ;;  %1315 = vmatprep.mubr.f32.mxu0 %v3142_v0  ;;  %v1063_v61 = vrot.slane %v2266_v47, 5 }
 0x53e   :  { %1353 = vmatpush1.msra.mxu1 %v3143_v25  ;;  %1386 = vmatprep.mubr.f32.mxu1 %v3142_v0 }
 0x53f   :  { %1432 = vmatprep.subr.mxu0 %v3144_v3  ;;  %1503 = vmatprep.subr.mxu1 %v3145_v5  ;;  %v1065_v5 = vrot.slane %v2271_v57, 5 }
 0x5de   :  { %v1136_v52 = vpop.f32.mrf.mxu0  ;;  %v1207_v46 = vpop.f32.mrf.mxu1 }
 0x5df   :  { %v1137_v53 = vadd.f32 %v1136_v52, %v1062_v29  ;;  %v1208_v44 = vadd.f32 %v1207_v46, %v1064_v31 }
 0x5e0   :  { %v1138_v48 = vpop.f32.mrf.mxu0  ;;  %v1209_v3 = vpop.f32.mrf.mxu1 }
 0x5e1   :  { %v1690_v45 = vmul.f32 -1.442695, %v1137_v53  ;;  %v1692_v2 = vmul.f32 -1.442695, %v1208_v44  ;;  %v1139_v25 = vadd.f32 %v1138_v48, %v1063_v61  ;;  %v1210_v27 = vadd.f32 %v1209_v3, %v1065_v5 }
 0x5e3   :  { %1803 = vpow2.f32 %v1690_v45  ;;  %v1691_v0 = vmul.f32 -1.442695, %v1139_v25  ;;  %v1693_v49 = vmul.f32 -1.442695, %v1210_v27 }
 0x5e4   :  { %1805 = vpow2.f32 %v1692_v2 }
 0x5e5   :  { %1807 = vpow2.f32 %v1691_v0 }
 0x5f0   :  { %v1804_v6 = vpop.eup %1803 }
 0x5f1   :  { %v1806_v58 = vpop.eup %1805  ;;  %v1224_v31 = vadd.f32 1.0, %v1804_v6 }
 0x5f2   :  { %v1808_v10 = vpop.eup %1807  ;;  %v1226_v52 = vadd.f32 1.0, %v1806_v58 }
 0x5f3   :  { %v1225_v29 = vadd.f32 1.0, %v1808_v10 }
 0x5f4   :  { %1809 = vrcp.f32 %v1226_v52 }
 0x5f5   :  { %1811 = vpow2.f32 %v1693_v49 }
 0x5f6   :  { %1813 = vrcp.f32 %v1225_v29 }
 0x5f7   :  { %1815 = vrcp.f32 %v1224_v31 }
 0x601   :  { %v1810_v48 = vpop.eup %1809 }
 0x602   :  { %v1812_v45 = vpop.eup %1811  ;;  %v1236_v53 = vmul.f32 2.0, %v1810_v48 }
 0x603   :  { %v1814_v2 = vpop.eup %1813  ;;  %v1227_v25 = vadd.f32 1.0, %v1812_v45 }
 0x604   :  { %v1694_v61 = vadd.f32 -1.0, %v1236_v53  ;;  %v1816_v0 = vpop.eup %1815  ;;  %v1238_v44 = vmul.f32 %v1814_v2, %v2713_v28 }
 0x605   :  { %1817 = vrcp.f32 %v1227_v25 }
 0x606   :  { %v1239_v46 = vmul.f32 %v1816_v0, %v1694_v61 }
 0x608   :  { %v2790_v3 = vadd.f32 %v1239_v46, %v1238_v44 }
 0x60a   :  { %1819 = vtanh.f32 %v2790_v3 }
 0x612   :  { %v1818_v10 = vpop.eup %1817 }
 0x617   :  { %v1820_v6 = vpop.eup %1819 }
 0x618   :  { %v1242_v49 = vmul.f32 %v1820_v6, %v1818_v10 }
 0x61a   :  { %1316 = vmatmul.mubr.f32.vlgmr.msra.gmra.mxu0 %v1242_v49  ;;  %1387 = vmatmul.mubr.f32.vlgmr.msra.gmra.mxu1 %v1242_v49  ;;  %v1618_v58 = vrot.slane %v1242_v49, 3 }
 0x61b   :  { %1433 = vmatpush1.msra.mxu0 %v2515_v7  ;;  %1504 = vmatpush1.msra.mxu1 %v2518_v8  ;;  %v3148_v7 = vld [vmem:[#allocation6_spill] sm:$0xff]  ;;  %v3149_v8 = vld [vmem:[#allocation7_spill] sm:$0xff] }
 0x61c   :  { %1434 = vmatprep.subr.mxu0 %v2521_v1  ;;  %1505 = vmatprep.subr.mxu1 %v2524_v9  ;;  %v2798_v28 = vsel %vm1634_vm4, %v2721_v60, %v1618_v58  ;;  %v3150_v1 = vld [vmem:[#allocation33_spill] sm:$0xff]  ;;  %v3151_v9 = vld [vmem:[#allocation10_spill] sm:$0xff] }
 0x61d   :  { %1435 = vmatpush1.msra.mxu0 %v2530_v11  ;;  %1506 = vmatpush1.msra.mxu1 %v2533_v12  ;;  %v3152_v11 = vld [vmem:[#allocation11_spill] sm:$0xff]  ;;  %v3153_v12 = vld [vmem:[#allocation12_spill] sm:$0xff] }
 0x61e   :  { %1436 = vmatprep.subr.mxu0 %v2536_v13  ;;  %1507 = vmatprep.subr.mxu1 %v2539_v14  ;;  %v3154_v13 = vld [vmem:[#allocation13_spill] sm:$0xff]  ;;  %v3155_v14 = vld [vmem:[#allocation14_spill] sm:$0xff] }
 0x61f   :  { %1437 = vmatpush1.msra.mxu0 %v2542_v15  ;;  %1508 = vmatpush1.msra.mxu1 %v2545_v4  ;;  %v3156_v15 = vld [vmem:[#allocation15_spill] sm:$0xff]  ;;  %v3157_v4 = vld [vmem:[#allocation16_spill] sm:$0xff] }
 0x620   :  { %1438 = vmatprep.subr.mxu0 %v2548_v16  ;;  %1509 = vmatprep.subr.mxu1 %v2551_v17  ;;  %v3158_v16 = vld [vmem:[#allocation17_spill] sm:$0xff]  ;;  %v3159_v17 = vld [vmem:[#allocation18_spill] sm:$0xff] }
 0x621   :  { %1439 = vmatpush1.msra.mxu0 %v2554_v18  ;;  %1510 = vmatpush1.msra.mxu1 %v2557_v19  ;;  %v3160_v18 = vld [vmem:[#allocation19_spill] sm:$0xff]  ;;  %v3161_v19 = vld [vmem:[#allocation20_spill] sm:$0xff] }
 0x622   :  { %1440 = vmatprep.subr.mxu0 %v2560_v20  ;;  %1511 = vmatprep.subr.mxu1 %v2563_v21  ;;  %v3162_v20 = vld [vmem:[#allocation21_spill] sm:$0xff]  ;;  %v3163_v21 = vld [vmem:[#allocation22_spill] sm:$0xff] }
 0x623   :  { %1441 = vmatpush1.msra.mxu0 %v2566_v22  ;;  %1512 = vmatpush1.msra.mxu1 %v2569_v23  ;;  %v3164_v22 = vld [vmem:[#allocation23_spill] sm:$0xff]  ;;  %v3165_v23 = vld [vmem:[#allocation24_spill] sm:$0xff] }
 0x624   :  { %1442 = vmatprep.subr.mxu0 %v2572_v24  ;;  %1513 = vmatprep.subr.mxu1 %v2575_v26  ;;  %v3166_v24 = vld [vmem:[#allocation25_spill] sm:$0xff]  ;;  %v3167_v26 = vld [vmem:[#allocation26_spill] sm:$0xff] }
 0x625   :  { %1443 = vmatpush1.msra.mxu0 %v2578_v30  ;;  %1514 = vmatpush1.msra.mxu1 %v2581_v32  ;;  %v3168_v30 = vmov 0.0   ;;  %v3169_v32 = vld [vmem:[#allocation27_spill] sm:$0xff] }
 0x626   :  { %1444 = vmatprep.subr.mxu0 %v2584_v33  ;;  %1515 = vmatprep.subr.mxu1 %v2587_v34  ;;  %v3170_v33 = vld [vmem:[#allocation31_spill] sm:$0xff] }
 0x627   :  { %1445 = vmatpush1.msra.mxu0 %v2590_v35  ;;  %1516 = vmatpush1.msra.mxu1 %v2593_v36  ;;  %v1243_v34 = vrot.slane %v3170_v33, 6  ;;  %v3171_v35 = vld [vmem:[#allocation32_spill] sm:$0xff] }
 0x628   :  { %1446 = vmatprep.subr.mxu0 %v2596_v37  ;;  %1517 = vmatprep.subr.mxu1 %v2599_v38  ;;  %v1245_v36 = vrot.slane %v3171_v35, 6 }
 0x629   :  { %1447 = vmatpush1.msra.mxu0 %v2602_v39  ;;  %1518 = vmatpush1.msra.mxu1 %v2605_v40 }
 0x62a   :  { %1448 = vmatprep.subr.mxu0 %v2608_v41  ;;  %1519 = vmatprep.subr.mxu1 %v2611_v42  ;;  %v1244_v41 = vrot.slane %v2266_v47, 6 }
 0x62b   :  { %1449 = vmatpush1.msra.mxu0 %v2614_v43  ;;  %1520 = vmatpush1.msra.mxu1 %v2617_v54 }
 0x62c   :  { %1450 = vmatprep.subr.mxu0 %v2620_v51  ;;  %1521 = vmatprep.subr.mxu1 %v2623_v50 }
 0x62d   :  { %1451 = vmatpush1.msra.mxu0 %v2626_v59  ;;  %1522 = vmatpush1.msra.mxu1 %v2629_v62  ;;  %v1246_v62 = vrot.slane %v2271_v57, 6 }
 0x62e   :  { %1452 = vmatprep.subr.mxu0 %v2632_v63  ;;  %1523 = vmatprep.subr.mxu1 %v2635_v55 }
 0x62f   :  { %1453 = vmatpush1.msra.mxu0 %v2638_v56  ;;  %1524 = vmatpush1.msra.mxu1 %v3148_v7 }
 0x630   :  { %1454 = vmatprep.subr.mxu0 %v3149_v8  ;;  %1525 = vmatprep.subr.mxu1 %v3150_v1  ;;  %v1424_v8 = vrot.slane %v3170_v33, 7  ;;  %v1426_v1 = vrot.slane %v3171_v35, 7 }
 0x631   :  { %1455 = vmatpush1.msra.mxu0 %v3151_v9  ;;  %1526 = vmatpush1.msra.mxu1 %v3152_v11 }
 0x632   :  { %1456 = vmatprep.subr.mxu0 %v3153_v12  ;;  %1527 = vmatprep.subr.mxu1 %v3154_v13  ;;  %v1425_v13 = vrot.slane %v2266_v47, 7 }
 0x633   :  { %1457 = vmatpush1.msra.mxu0 %v3155_v14  ;;  %1528 = vmatpush1.msra.mxu1 %v3156_v15 }
 0x634   :  { %1458 = vmatprep.subr.mxu0 %v3157_v4  ;;  %1529 = vmatprep.subr.mxu1 %v3158_v16 }
 0x635   :  { %1459 = vmatpush1.msra.mxu0 %v3159_v17  ;;  %1530 = vmatpush1.msra.mxu1 %v3160_v18 }
 0x636   :  { %1460 = vmatprep.subr.mxu0 %v3161_v19  ;;  %1531 = vmatprep.subr.mxu1 %v3162_v20 }
 0x637   :  { %1461 = vmatpush1.msra.mxu0 %v3163_v21  ;;  %1532 = vmatpush1.msra.mxu1 %v3164_v22 }
 0x638   :  { %1462 = vmatprep.subr.mxu0 %v3165_v23  ;;  %1533 = vmatprep.subr.mxu1 %v3166_v24 }
 0x639   :  { %1463 = vmatpush1.msra.mxu0 %v3167_v26  ;;  %1496 = vmatprep.mubr.f32.mxu0 %v3168_v30 }
 0x63a   :  { %1534 = vmatpush1.msra.mxu1 %v3169_v32  ;;  %1567 = vmatprep.mubr.f32.mxu1 %v3168_v30 }
 0x6da   :  { %v1317_v37 = vpop.f32.mrf.mxu0  ;;  %v1388_v38 = vpop.f32.mrf.mxu1 }
 0x6db   :  { %v1318_v39 = vadd.f32 %v1317_v37, %v1243_v34  ;;  %v1389_v40 = vadd.f32 %v1388_v38, %v1245_v36 }
 0x6dc   :  { %v1319_v42 = vpop.f32.mrf.mxu0  ;;  %v1390_v59 = vpop.f32.mrf.mxu1 }
 0x6dd   :  { %v1695_v43 = vmul.f32 -1.442695, %v1318_v39  ;;  %v1697_v54 = vmul.f32 -1.442695, %v1389_v40  ;;  %v1320_v51 = vadd.f32 %v1319_v42, %v1244_v41  ;;  %v1391_v63 = vadd.f32 %v1390_v59, %v1246_v62  ;;  %v1706_v59 = vld [vmem:[#allocation2] ss:$0 sm:$0xff] }
 0x6df   :  { %1821 = vpow2.f32 %v1695_v43  ;;  %v1696_v50 = vmul.f32 -1.442695, %v1320_v51  ;;  %v1698_v60 = vmul.f32 -1.442695, %v1391_v63 }
 0x6e0   :  { %1823 = vpow2.f32 %v1697_v54  ;;  %v1705_v54 = vld [vmem:[%s2880_s4] ss:$0 sm:$0xff] }
 0x6e1   :  { %1825 = vpow2.f32 %v1696_v50 }
 0x6ec   :  { %v1822_v55 = vpop.eup %1821 }
 0x6ed   :  { %v1824_v56 = vpop.eup %1823  ;;  %v1405_v29 = vadd.f32 1.0, %v1822_v55 }
 0x6ee   :  { %v1826_v27 = vpop.eup %1825  ;;  %v1407_v5 = vadd.f32 1.0, %v1824_v56 }
 0x6ef   :  { %v1406_v52 = vadd.f32 1.0, %v1826_v27 }
 0x6f0   :  { %1827 = vrcp.f32 %v1407_v5 }
 0x6f1   :  { %1829 = vpow2.f32 %v1698_v60 }
 0x6f2   :  { %1831 = vrcp.f32 %v1406_v52 }
 0x6f3   :  { %1833 = vrcp.f32 %v1405_v29 }
 0x6fd   :  { %v1828_v31 = vpop.eup %1827 }
 0x6fe   :  { %v1830_v48 = vpop.eup %1829  ;;  %v1417_v45 = vmul.f32 2.0, %v1828_v31 }
 0x6ff   :  { %v1832_v53 = vpop.eup %1831  ;;  %v1408_v0 = vadd.f32 1.0, %v1830_v48 }
 0x700   :  { %v1699_v2 = vadd.f32 -1.0, %v1417_v45  ;;  %v1834_v61 = vpop.eup %1833  ;;  %v1419_v46 = vmul.f32 %v1832_v53, %v2790_v3 }
 0x701   :  { %1835 = vrcp.f32 %v1408_v0 }
 0x702   :  { %v1420_v25 = vmul.f32 %v1834_v61, %v1699_v2 }
 0x704   :  { %v1421_v44 = vadd.f32 %v1420_v25, %v1419_v46 }
 0x706   :  { %1837 = vtanh.f32 %v1421_v44 }
 0x70e   :  { %v1836_v10 = vpop.eup %1835 }
 0x713   :  { %v1838_v6 = vpop.eup %1837 }
 0x714   :  { %v1423_v49 = vmul.f32 %v1838_v6, %v1836_v10 }
 0x716   :  { %1497 = vmatmul.mubr.f32.vlgmr.msra.gmra.mxu0 %v1423_v49  ;;  %1568 = vmatmul.mubr.f32.vlgmr.msra.gmra.mxu1 %v1423_v49  ;;  %v1621_v58 = vrot.slane %v1423_v49, 2 }
 0x718   :  { %v1637_v7 = vsel %vm1636_vm5, %v2798_v28, %v1621_v58  ;;  %v1427_v28 = vrot.slane %v2271_v57, 7 }
 0x7d6   :  { %v1498_v9 = vpop.f32.mrf.mxu0  ;;  %v1569_v11 = vpop.f32.mrf.mxu1 }
 0x7d7   :  { %v1499_v12 = vadd.f32 %v1498_v9, %v1424_v8  ;;  %v1570_v3 = vadd.f32 %v1569_v11, %v1426_v1 }
 0x7d8   :  { %v1500_v14 = vpop.f32.mrf.mxu0  ;;  %v1571_v18 = vpop.f32.mrf.mxu1 }
 0x7d9   :  { %v1700_v15 = vmul.f32 -1.442695, %v1499_v12  ;;  %v1702_v4 = vmul.f32 -1.442695, %v1570_v3  ;;  %v1501_v16 = vadd.f32 %v1500_v14, %v1425_v13  ;;  %v1572_v19 = vadd.f32 %v1571_v18, %v1427_v28 }
 0x7db   :  { %1839 = vpow2.f32 %v1700_v15  ;;  %v1701_v17 = vmul.f32 -1.442695, %v1501_v16  ;;  %v1703_v22 = vmul.f32 -1.442695, %v1572_v19 }
 0x7dc   :  { %1841 = vpow2.f32 %v1702_v4 }
 0x7dd   :  { %1843 = vpow2.f32 %v1701_v17 }
 0x7e8   :  { %v1840_v20 = vpop.eup %1839 }
 0x7e9   :  { %v1842_v21 = vpop.eup %1841  ;;  %v1586_v30 = vadd.f32 1.0, %v1840_v20 }
 0x7ea   :  { %v1844_v23 = vpop.eup %1843  ;;  %v1588_v24 = vadd.f32 1.0, %v1842_v21 }
 0x7eb   :  { %v1587_v26 = vadd.f32 1.0, %v1844_v23 }
 0x7ec   :  { %1845 = vrcp.f32 %v1588_v24 }
 0x7ed   :  { %1847 = vpow2.f32 %v1703_v22 }
 0x7ee   :  { %1849 = vrcp.f32 %v1587_v26 }
 0x7ef   :  { %1851 = vrcp.f32 %v1586_v30 }
 0x7f9   :  { %v1846_v47 = vpop.eup %1845 }
 0x7fa   :  { %v1848_v32 = vpop.eup %1847  ;;  %v1598_v33 = vmul.f32 2.0, %v1846_v47 }
 0x7fb   :  { %v1850_v34 = vpop.eup %1849  ;;  %v1589_v37 = vadd.f32 1.0, %v1848_v32 }
 0x7fc   :  { %v1704_v35 = vadd.f32 -1.0, %v1598_v33  ;;  %v1852_v36 = vpop.eup %1851  ;;  %v1600_v38 = vmul.f32 %v1850_v34, %v1421_v44 }
 0x7fd   :  { %1853 = vrcp.f32 %v1589_v37 }
 0x7fe   :  { %v1601_v57 = vmul.f32 %v1852_v36, %v1704_v35 }
 0x800   :  { %v1602_v39 = vadd.f32 %v1601_v57, %v1600_v38 }
 0x802   :  { %1855 = vtanh.f32 %v1602_v39 }
 0x80a   :  { %v1854_v40 = vpop.eup %1853 }
 0x80f   :  { %v1856_v41 = vpop.eup %1855 }
 0x810   :  { %v1604_v42 = vmul.f32 %v1856_v41, %v1854_v40 }
 0x812   :  { %v1624_v43 = vrot.slane %v1604_v42, 1 }
 0x814   :  { %v1639_v51 = vsel %vm1638_vm6, %v1637_v7, %v1624_v43 }
 0x815   :  { %v1647_v50 = vmul.f32 %v1705_v54, %v1639_v51 }
 0x817   :  { %1648 = vadd.xlane.f32.xlu0 %v1647_v50 }
 0x8a0   :  { %v1649_v62 = vpop.xlane.xlu0 %1648 }
 0x8a1   :  { %v1657_v63 = vadd.f32 %v1706_v59, %v1649_v62 }
 0x8a3   :  { %1659 = vst.msk [vmem:[%s2882_s6] sm:$0xff] %vm1658_vm7, %v1657_v63 }
 0x8a4   :  { %1664 = vsyncpa [#allocation4], 1 }

</bundles_post_ra>
